<compile_context>
chip_gen: v7x
topology: tpu7x:2x2x1
jax: 0.10.0
libtpu: 0.0.40
codegen_flags: <defaults>
</compile_context>

<pallas_src>
import functools

import jax
import jax.numpy as jnp
from jax.experimental import pallas as pl
from jax.experimental.pallas import tpu as pltpu


def _round_up(x, m):
    return (x + m - 1) // m * m


def _pad_gate_cols(w, nh, nh_p):
    """(K, 4*nh) -> (K, 4*nh_p).

    Each PyTorch gate block [i | f | g | o] is zero-padded from nh to nh_p
    columns so every gate slice inside the kernel is 128-lane aligned."""
    k = w.shape[0]
    out = jnp.zeros((k, 4 * nh_p), w.dtype)
    for g in range(4):
        out = out.at[:, g * nh_p:g * nh_p + nh].set(w[:, g * nh:(g + 1) * nh])
    return out


# ----------------------------------------------------------------------------
# Pallas kernel: per-chunk (input projection + LSTM recurrence)
# Grid = (num_batch_blocks, num_time_chunks); time is the inner "arbitrary"
# axis, batch blocks are "parallel" (megacore-shardable on v7x).
# ----------------------------------------------------------------------------
def _lstm_encoder_kernel(x_ref, wih_ref, whh_ref, b_ref,
                         hn_ref, cn_ref, gx_scr, *,
                         seq_len, chunk_t, batch_blk, nh_p,
                         needs_mask, unroll):
    t_chunk = pl.program_id(1)

    # h/c carry lives in the resident output blocks across the time axis.
    @pl.when(t_chunk == 0)
    def _():
        hn_ref[...] = jnp.zeros_like(hn_ref)     # nn.LSTM default zero state
        cn_ref[...] = jnp.zeros_like(cn_ref)

    # (1) Input projection for THIS chunk only: one MXU matmul over
    #     chunk_t*batch_blk rows, bf16 operands, f32 accumulate, bias fused.
    gx_scr[...] = (jnp.dot(x_ref[0], wih_ref[...],
                           preferred_element_type=jnp.float32)
                   + b_ref[...])

    whh = whh_ref[...]                            # bf16 (nh_p, 4*nh_p)

    def sigm(v):
        # sigmoid(x) = 0.5*(tanh(0.5*x)+1): a single EUP pass per gate.
        return 0.5 * (jnp.tanh(0.5 * v) + 1.0)

    # (2) Sequential recurrence over the chunk; h/c are vreg carries, one
    #     small bf16 matmul + EUP nonlinearities per step.
    def step(i, carry):
        h, c = carry
        row = pl.multiple_of(i * batch_blk, batch_blk)   # sublane-aligned
        gates = gx_scr[pl.ds(row, batch_blk), :] + jnp.dot(
            h.astype(jnp.bfloat16), whh, preferred_element_type=jnp.float32)
        # PyTorch LSTM gate order: input, forget, cell (g), output.
        # nh_p is a multiple of 128 -> each slice is whole vregs.
        i_g = sigm(gates[:, 0 * nh_p:1 * nh_p])
        f_g = sigm(gates[:, 1 * nh_p:2 * nh_p])
        g_g = jnp.tanh(gates[:, 2 * nh_p:3 * nh_p])
        o_g = sigm(gates[:, 3 * nh_p:4 * nh_p])
        c_new = f_g * c + i_g * g_g
        h_new = o_g * jnp.tanh(c_new)
        if needs_mask:
            valid = (t_chunk * chunk_t + i) < seq_len    # ignore padded steps
            h_new = jnp.where(valid, h_new, h)
            c_new = jnp.where(valid, c_new, c)
        return h_new, c_new

    h0 = hn_ref[...]
    c0 = cn_ref[...]
    h_n, c_n = jax.lax.fori_loop(0, chunk_t, step, (h0, c0), unroll=unroll)

    # (3) Lane-dense writes, once per chunk (output block stays resident
    #     across the "arbitrary" time axis; HBM writeback only at the end).
    hn_ref[...] = h_n
    cn_ref[...] = c_n


# ----------------------------------------------------------------------------
# Wrapper mirroring VQVAE_Encoder.forward(input) in eval mode
# ----------------------------------------------------------------------------
def vqvae_encoder_forward(tokens, params):
    """tokens: int32 (B, T).  Returns (last_state (B,1,nh), last_cell (B,1,nh), None)."""
    emb_table = params["embedding"]
    w_ih, w_hh = params["w_ih"], params["w_hh"]
    bias = params["b_ih"] + params["b_hh"]

    B, T = tokens.shape
    ni = emb_table.shape[1]
    nh = w_hh.shape[1]

    # --- padded / blocked geometry ------------------------------------------
    nh_p = _round_up(nh, 128)                 # lane-dense h/c, 128-aligned gates
    ni_p = _round_up(ni, 128)                 # lane-dense x / MXU K dim
    if B >= 16:
        nb = 2                                # batch-parallel split (2 TCs on v7x)
        batch_p = _round_up(B, 16)
    else:
        nb = 1
        batch_p = _round_up(max(B, 1), 8)     # fill f32 sublanes
    batch_blk = batch_p // nb

    # Time chunk sized against a small VMEM budget (fits v5e 16 MiB scoped
    # default and v7x 64 MiB physical comfortably): gx chunk (f32) + double-
    # buffered bf16 x chunk.
    budget_bytes = 4 << 20
    per_step = batch_blk * (4 * nh_p * 4 + 2 * ni_p * 2)
    chunk_t = int(max(1, min(T, budget_bytes // per_step)))
    t_pad = _round_up(T, chunk_t)
    n_chunks = t_pad // chunk_t
    needs_mask = (t_pad != T)
    unroll = int(min(chunk_t, 8))             # bounded unroll: no vreg spills

    # --- embedding lookup + layout (dropout_in == identity in eval) ----------
    # Tokens are gathered already time-major and batch-padded; the (T,B,ni)
    # activation tensor is never transposed in the wrapper.  NOTE: padded
    # batch rows hold token id 0, so they compute non-zero h/c -- harmless,
    # those rows are sliced off below.
    tok_tm = jnp.zeros((t_pad, batch_p), tokens.dtype).at[:T, :B].set(tokens.T)
    tok_blk = tok_tm.reshape(t_pad, nb, batch_blk).transpose(1, 0, 2)
    x = emb_table[tok_blk]                                  # (nb, t_pad, batch_blk, ni)
    x = jnp.pad(x, ((0, 0), (0, 0), (0, 0), (0, ni_p - ni)))
    x = x.reshape(nb, t_pad * batch_blk, ni_p).astype(jnp.bfloat16)

    # --- weights: gate-padded, lane-dense, bf16 MXU operands ------------------
    wih_p = _pad_gate_cols(w_ih.T.astype(jnp.float32), nh, nh_p)       # (ni, 4*nh_p)
    wih_p = jnp.pad(wih_p, ((0, ni_p - ni), (0, 0))).astype(jnp.bfloat16)
    whh_p = _pad_gate_cols(w_hh.T.astype(jnp.float32), nh, nh_p)       # (nh, 4*nh_p)
    whh_p = jnp.pad(whh_p, ((0, nh_p - nh), (0, 0))).astype(jnp.bfloat16)
    b_p = _pad_gate_cols(bias[None, :].astype(jnp.float32), nh, nh_p)  # (1, 4*nh_p) f32

    # --- explicit VMEM budget (double-buffered x chunks + weights + scratch) --
    vmem_bytes = (2 * chunk_t * batch_blk * ni_p * 2        # x chunks, bf16, 2x buf
                  + ni_p * 4 * nh_p * 2                     # W_ih bf16
                  + nh_p * 4 * nh_p * 2                     # W_hh bf16
                  + 4 * nh_p * 4                            # bias f32
                  + chunk_t * batch_blk * 4 * nh_p * 4      # gx scratch f32
                  + 2 * 2 * batch_blk * nh_p * 4)           # h/c output blocks
    vmem_limit = int(min(100 * 1024 * 1024,
                         max(16 * 1024 * 1024, vmem_bytes * 2)))

    kernel = functools.partial(_lstm_encoder_kernel,
                               seq_len=T, chunk_t=chunk_t,
                               batch_blk=batch_blk, nh_p=nh_p,
                               needs_mask=needs_mask, unroll=unroll)

    hn, cn = pl.pallas_call(
        kernel,
        out_shape=(jax.ShapeDtypeStruct((batch_p, nh_p), jnp.float32),
                   jax.ShapeDtypeStruct((batch_p, nh_p), jnp.float32)),
        grid_spec=pltpu.PrefetchScalarGridSpec(
            num_scalar_prefetch=0,
            grid=(nb, n_chunks),
            in_specs=[
                pl.BlockSpec((1, chunk_t * batch_blk, ni_p),
                             lambda b, t: (b, t, 0)),          # x chunk (pipelined)
                pl.BlockSpec((ni_p, 4 * nh_p), lambda b, t: (0, 0)),   # W_ih (resident)
                pl.BlockSpec((nh_p, 4 * nh_p), lambda b, t: (0, 0)),   # W_hh (resident)
                pl.BlockSpec((1, 4 * nh_p), lambda b, t: (0, 0)),      # bias (resident)
            ],
            out_specs=(pl.BlockSpec((batch_blk, nh_p), lambda b, t: (b, 0)),
                       pl.BlockSpec((batch_blk, nh_p), lambda b, t: (b, 0))),
            scratch_shapes=[pltpu.VMEM((chunk_t * batch_blk, 4 * nh_p),
                                       jnp.float32)],
        ),
        compiler_params=pltpu.CompilerParams(
            dimension_semantics=("parallel", "arbitrary"),
            vmem_limit_bytes=vmem_limit),
    )(x, wih_p, whh_p, b_p)

    # PyTorch: last_state.permute(1, 0, 2) turns (1, B, nh) into (B, 1, nh).
    last_state = hn[:B, :nh][:, None, :]
    last_cell = cn[:B, :nh][:, None, :]
    return last_state, last_cell, None


# ----------------------------------------------------------------------------
# Pure-JAX reference (for correctness check)
# ----------------------------------------------------------------------------
def _reference_forward(tokens, params):
    emb = params["embedding"][tokens].astype(jnp.float32)      # (B, T, ni)
    nh = params["w_hh"].shape[1]
    B = tokens.shape[0]
    h = jnp.zeros((B, nh), jnp.float32)
    c = jnp.zeros((B, nh), jnp.float32)

    def step(carry, x_t):
        h, c = carry
        gates = (x_t @ params["w_ih"].T + h @ params["w_hh"].T
                 + params["b_ih"] + params["b_hh"])
        i = jax.nn.sigmoid(gates[:, 0 * nh:1 * nh])
        f = jax.nn.sigmoid(gates[:, 1 * nh:2 * nh])
        g = jnp.tanh(gates[:, 2 * nh:3 * nh])
        o = jax.nn.sigmoid(gates[:, 3 * nh:4 * nh])
        c_new = f * c + i * g
        h_new = o * jnp.tanh(c_new)
        return (h_new, c_new), None

    (h_n, c_n), _ = jax.lax.scan(step, (h, c), jnp.transpose(emb, (1, 0, 2)))
    return h_n[:, None, :], c_n[:, None, :], None


# ----------------------------------------------------------------------------
# Main
# ----------------------------------------------------------------------------
if __name__ == "__main__":
    # Small shapes consistent with the module
    B, T = 2, 8
    V = 32       # len(vocab.word2id)
    NI = 16      # args.ni
    NH = 32      # args.enc_nh

    key = jax.random.PRNGKey(0)
    k_emb, k_wih, k_whh, k_bih, k_bhh, k_tok = jax.random.split(key, 6)

    params = {
        "embedding": jax.random.normal(k_emb, (V, NI), jnp.float32) * 0.1,
        "w_ih": jax.random.normal(k_wih, (4 * NH, NI), jnp.float32) * 0.1,
        "w_hh": jax.random.normal(k_whh, (4 * NH, NH), jnp.float32) * 0.1,
        "b_ih": jax.random.normal(k_bih, (4 * NH,), jnp.float32) * 0.1,
        "b_hh": jax.random.normal(k_bhh, (4 * NH,), jnp.float32) * 0.1,
    }
    tokens = jax.random.randint(k_tok, (B, T), 0, V, dtype=jnp.int32)

    last_state, last_cell, extra = vqvae_encoder_forward(tokens, params)
    jax.block_until_ready((last_state, last_cell))

    ref_state, ref_cell, _ = _reference_forward(tokens, params)
    assert last_state.shape == (B, 1, NH)
    assert last_cell.shape == (B, 1, NH)
    assert extra is None
    # bf16 MXU operands (f32 accumulate) -> relaxed tolerance vs f32 reference.
    assert jnp.allclose(last_state, ref_state, atol=2e-2, rtol=2e-2)
    assert jnp.allclose(last_cell, ref_cell, atol=2e-2, rtol=2e-2)

    # TODO(synk): bidirectional=True branch (reverse LSTM + (fwd, bck) outputs)
    # not implemented (module default is bidirectional=False); dropout_in is
    # identity (eval mode); embedding gather stays in the JAX wrapper;
    # interleaving chunk k+1's projection with chunk k's recurrence (manual
    # 2-deep gx buffer) left for a future revision.
    print("KERNEL_OK")
</pallas_src>

<mosaic_0001>
module attributes {stable_mosaic.version = 11 : i64} {
  func.func @_lstm_encoder_kernel(%arg0: i32, %arg1: i32, %arg2: memref<1x64x128xbf16, #tpu.memory_space<vmem>>, %arg3: memref<128x512xbf16, #tpu.memory_space<vmem>>, %arg4: memref<128x512xbf16, #tpu.memory_space<vmem>>, %arg5: memref<1x512xf32, #tpu.memory_space<vmem>>, %arg6: memref<8x128xf32, #tpu.memory_space<vmem>>, %arg7: memref<8x128xf32, #tpu.memory_space<vmem>>, %arg8: memref<64x512xf32, #tpu.memory_space<vmem>>) attributes {dimension_semantics = [#tpu.dimension_semantics<parallel>, #tpu.dimension_semantics<arbitrary>], iteration_bounds = array<i64: 1, 1>, scalar_prefetch = 0 : i64, scratch_operands = 1 : i64, tpu.core_type = #tpu.core_type<tc>, window_params = [{transform_indices = @transform_0, window_bounds = array<i64: 1, 64, 128>}, {pipeline_mode = #tpu.pipeline_mode<synchronous>, transform_indices = @transform_1, window_bounds = array<i64: 128, 512>}, {pipeline_mode = #tpu.pipeline_mode<synchronous>, transform_indices = @transform_2, window_bounds = array<i64: 128, 512>}, {pipeline_mode = #tpu.pipeline_mode<synchronous>, transform_indices = @transform_3, window_bounds = array<i64: 1, 512>}, {transform_indices = @transform_4, window_bounds = array<i64: 8, 128>}, {transform_indices = @transform_5, window_bounds = array<i64: 8, 128>}]} {
    %c0_i32 = arith.constant 0 : i32
    %0 = arith.cmpi eq, %arg1, %c0_i32 : i32
    %1 = arith.extui %0 : i1 to i32
    %c0_i32_0 = arith.constant 0 : i32
    %2 = arith.cmpi ne, %1, %c0_i32_0 : i32
    scf.if %2 {
      %cst_116 = arith.constant 0.000000e+00 : f32
      %320 = vector.broadcast %cst_116 : f32 to vector<8x128xf32>
      %c0_117 = arith.constant 0 : index
      %c0_118 = arith.constant 0 : index
      %321 = vector.load %arg6[%c0_117, %c0_118] : memref<8x128xf32, #tpu.memory_space<vmem>>, vector<8x128xf32>
      tpu.vector_store %arg6[%c0_117, %c0_118], %320 {strides = array<i32>} : memref<8x128xf32, #tpu.memory_space<vmem>>, vector<8x128xf32>,
      %cst_119 = arith.constant 0.000000e+00 : f32
      %322 = vector.broadcast %cst_119 : f32 to vector<8x128xf32>
      %c0_120 = arith.constant 0 : index
      %c0_121 = arith.constant 0 : index
      %323 = vector.load %arg7[%c0_120, %c0_121] : memref<8x128xf32, #tpu.memory_space<vmem>>, vector<8x128xf32>
      tpu.vector_store %arg7[%c0_120, %c0_121], %322 {strides = array<i32>} : memref<8x128xf32, #tpu.memory_space<vmem>>, vector<8x128xf32>,
    } else {
    }
    %c0 = arith.constant 0 : index
    %c0_1 = arith.constant 0 : index
    %c0_2 = arith.constant 0 : index
    %3 = vector.load %arg2[%c0, %c0_1, %c0_2] : memref<1x64x128xbf16, #tpu.memory_space<vmem>>, vector<1x64x128xbf16>
    %4 = vector.shape_cast %3 : vector<1x64x128xbf16> to vector<64x128xbf16>
    %c0_3 = arith.constant 0 : index
    %c0_4 = arith.constant 0 : index
    %5 = vector.load %arg3[%c0_3, %c0_4] : memref<128x512xbf16, #tpu.memory_space<vmem>>, vector<128x512xbf16>
    %cst = arith.constant dense<0.000000e+00> : vector<64x512xf32>
    %6 = tpu.matmul %4, %5, %cst {dimension_numbers = #tpu.dot_dimension_numbers<[1], [0], [0], [1], [0, 0, 1, 1], [], []>} : vector<64x128xbf16>, vector<128x512xbf16>, vector<64x512xf32> -> vector<64x512xf32>
    %c0_5 = arith.constant 0 : index
    %c0_6 = arith.constant 0 : index
    %7 = vector.load %arg5[%c0_5, %c0_6] : memref<1x512xf32, #tpu.memory_space<vmem>>, vector<1x512xf32>
    %8 = vector.broadcast %7 : vector<1x512xf32> to vector<64x512xf32>
    %9 = arith.addf %6, %8 : vector<64x512xf32>
    %c0_7 = arith.constant 0 : index
    %c0_8 = arith.constant 0 : index
    %10 = vector.load %arg8[%c0_7, %c0_8] : memref<64x512xf32, #tpu.memory_space<vmem>>, vector<64x512xf32>
    tpu.vector_store %arg8[%c0_7, %c0_8], %9 {strides = array<i32>} : memref<64x512xf32, #tpu.memory_space<vmem>>, vector<64x512xf32>,
    %c0_9 = arith.constant 0 : index
    %c0_10 = arith.constant 0 : index
    %11 = vector.load %arg4[%c0_9, %c0_10] : memref<128x512xbf16, #tpu.memory_space<vmem>>, vector<128x512xbf16>
    %c0_11 = arith.constant 0 : index
    %c0_12 = arith.constant 0 : index
    %12 = vector.load %arg6[%c0_11, %c0_12] : memref<8x128xf32, #tpu.memory_space<vmem>>, vector<8x128xf32>
    %c0_13 = arith.constant 0 : index
    %c0_14 = arith.constant 0 : index
    %13 = vector.load %arg7[%c0_13, %c0_14] : memref<8x128xf32, #tpu.memory_space<vmem>>, vector<8x128xf32>
    %c0_i32_15 = arith.constant 0 : i32
    %c8_i32 = arith.constant 8 : i32
    %14 = arith.muli %c0_i32_15, %c8_i32 : i32
    %15 = tpu.assume_multiple %14, 8 : i32
    %16 = arith.index_cast %15 : i32 to index
    %c0_16 = arith.constant 0 : index
    %17 = vector.load %arg8[%16, %c0_16] : memref<64x512xf32, #tpu.memory_space<vmem>>, vector<8x512xf32>
    %18 = arith.truncf %12 : vector<8x128xf32> to vector<8x128xbf16>
    %cst_17 = arith.constant dense<0.000000e+00> : vector<8x512xf32>
    %19 = tpu.matmul %18, %11, %cst_17 {dimension_numbers = #tpu.dot_dimension_numbers<[1], [0], [0], [1], [0, 0, 1, 1], [], []>} : vector<8x128xbf16>, vector<128x512xbf16>, vector<8x512xf32> -> vector<8x512xf32>
    %20 = arith.addf %17, %19 : vector<8x512xf32>
    %21 = vector.extract_strided_slice %20 {offsets = [0, 0], sizes = [8, 128], strides = [1, 1]} : vector<8x512xf32> to vector<8x128xf32>
    %cst_18 = arith.constant 5.000000e-01 : f32
    %22 = vector.broadcast %cst_18 : f32 to vector<8x128xf32>
    %23 = arith.mulf %22, %21 : vector<8x128xf32>
    %24 = math.tanh %23 : vector<8x128xf32>
    %cst_19 = arith.constant 1.000000e+00 : f32
    %25 = vector.broadcast %cst_19 : f32 to vector<8x128xf32>
    %26 = arith.addf %24, %25 : vector<8x128xf32>
    %cst_20 = arith.constant 5.000000e-01 : f32
    %27 = vector.broadcast %cst_20 : f32 to vector<8x128xf32>
    %28 = arith.mulf %27, %26 : vector<8x128xf32>
    %29 = vector.extract_strided_slice %20 {offsets = [0, 128], sizes = [8, 128], strides = [1, 1]} : vector<8x512xf32> to vector<8x128xf32>
    %cst_21 = arith.constant 5.000000e-01 : f32
    %30 = vector.broadcast %cst_21 : f32 to vector<8x128xf32>
    %31 = arith.mulf %30, %29 : vector<8x128xf32>
    %32 = math.tanh %31 : vector<8x128xf32>
    %cst_22 = arith.constant 1.000000e+00 : f32
    %33 = vector.broadcast %cst_22 : f32 to vector<8x128xf32>
    %34 = arith.addf %32, %33 : vector<8x128xf32>
    %cst_23 = arith.constant 5.000000e-01 : f32
    %35 = vector.broadcast %cst_23 : f32 to vector<8x128xf32>
    %36 = arith.mulf %35, %34 : vector<8x128xf32>
    %37 = vector.extract_strided_slice %20 {offsets = [0, 256], sizes = [8, 128], strides = [1, 1]} : vector<8x512xf32> to vector<8x128xf32>
    %38 = math.tanh %37 : vector<8x128xf32>
    %39 = vector.extract_strided_slice %20 {offsets = [0, 384], sizes = [8, 128], strides = [1, 1]} : vector<8x512xf32> to vector<8x128xf32>
    %cst_24 = arith.constant 5.000000e-01 : f32
    %40 = vector.broadcast %cst_24 : f32 to vector<8x128xf32>
    %41 = arith.mulf %40, %39 : vector<8x128xf32>
    %42 = math.tanh %41 : vector<8x128xf32>
    %cst_25 = arith.constant 1.000000e+00 : f32
    %43 = vector.broadcast %cst_25 : f32 to vector<8x128xf32>
    %44 = arith.addf %42, %43 : vector<8x128xf32>
    %cst_26 = arith.constant 5.000000e-01 : f32
    %45 = vector.broadcast %cst_26 : f32 to vector<8x128xf32>
    %46 = arith.mulf %45, %44 : vector<8x128xf32>
    %47 = arith.mulf %36, %13 : vector<8x128xf32>
    %48 = arith.mulf %28, %38 : vector<8x128xf32>
    %49 = arith.addf %47, %48 : vector<8x128xf32>
    %50 = math.tanh %49 : vector<8x128xf32>
    %51 = arith.mulf %46, %50 : vector<8x128xf32>
    %c1_i32 = arith.constant 1 : i32
    %c8_i32_27 = arith.constant 8 : i32
    %52 = arith.muli %c1_i32, %c8_i32_27 : i32
    %53 = tpu.assume_multiple %52, 8 : i32
    %54 = arith.index_cast %53 : i32 to index
    %c0_28 = arith.constant 0 : index
    %55 = vector.load %arg8[%54, %c0_28] : memref<64x512xf32, #tpu.memory_space<vmem>>, vector<8x512xf32>
    %56 = arith.truncf %51 : vector<8x128xf32> to vector<8x128xbf16>
    %cst_29 = arith.constant dense<0.000000e+00> : vector<8x512xf32>
    %57 = tpu.matmul %56, %11, %cst_29 {dimension_numbers = #tpu.dot_dimension_numbers<[1], [0], [0], [1], [0, 0, 1, 1], [], []>} : vector<8x128xbf16>, vector<128x512xbf16>, vector<8x512xf32> -> vector<8x512xf32>
    %58 = arith.addf %55, %57 : vector<8x512xf32>
    %59 = vector.extract_strided_slice %58 {offsets = [0, 0], sizes = [8, 128], strides = [1, 1]} : vector<8x512xf32> to vector<8x128xf32>
    %cst_30 = arith.constant 5.000000e-01 : f32
    %60 = vector.broadcast %cst_30 : f32 to vector<8x128xf32>
    %61 = arith.mulf %60, %59 : vector<8x128xf32>
    %62 = math.tanh %61 : vector<8x128xf32>
    %cst_31 = arith.constant 1.000000e+00 : f32
    %63 = vector.broadcast %cst_31 : f32 to vector<8x128xf32>
    %64 = arith.addf %62, %63 : vector<8x128xf32>
    %cst_32 = arith.constant 5.000000e-01 : f32
    %65 = vector.broadcast %cst_32 : f32 to vector<8x128xf32>
    %66 = arith.mulf %65, %64 : vector<8x128xf32>
    %67 = vector.extract_strided_slice %58 {offsets = [0, 128], sizes = [8, 128], strides = [1, 1]} : vector<8x512xf32> to vector<8x128xf32>
    %cst_33 = arith.constant 5.000000e-01 : f32
    %68 = vector.broadcast %cst_33 : f32 to vector<8x128xf32>
    %69 = arith.mulf %68, %67 : vector<8x128xf32>
    %70 = math.tanh %69 : vector<8x128xf32>
    %cst_34 = arith.constant 1.000000e+00 : f32
    %71 = vector.broadcast %cst_34 : f32 to vector<8x128xf32>
    %72 = arith.addf %70, %71 : vector<8x128xf32>
    %cst_35 = arith.constant 5.000000e-01 : f32
    %73 = vector.broadcast %cst_35 : f32 to vector<8x128xf32>
    %74 = arith.mulf %73, %72 : vector<8x128xf32>
    %75 = vector.extract_strided_slice %58 {offsets = [0, 256], sizes = [8, 128], strides = [1, 1]} : vector<8x512xf32> to vector<8x128xf32>
    %76 = math.tanh %75 : vector<8x128xf32>
    %77 = vector.extract_strided_slice %58 {offsets = [0, 384], sizes = [8, 128], strides = [1, 1]} : vector<8x512xf32> to vector<8x128xf32>
    %cst_36 = arith.constant 5.000000e-01 : f32
    %78 = vector.broadcast %cst_36 : f32 to vector<8x128xf32>
    %79 = arith.mulf %78, %77 : vector<8x128xf32>
    %80 = math.tanh %79 : vector<8x128xf32>
    %cst_37 = arith.constant 1.000000e+00 : f32
    %81 = vector.broadcast %cst_37 : f32 to vector<8x128xf32>
    %82 = arith.addf %80, %81 : vector<8x128xf32>
    %cst_38 = arith.constant 5.000000e-01 : f32
    %83 = vector.broadcast %cst_38 : f32 to vector<8x128xf32>
    %84 = arith.mulf %83, %82 : vector<8x128xf32>
    %85 = arith.mulf %74, %49 : vector<8x128xf32>
    %86 = arith.mulf %66, %76 : vector<8x128xf32>
    %87 = arith.addf %85, %86 : vector<8x128xf32>
    %88 = math.tanh %87 : vector<8x128xf32>
    %89 = arith.mulf %84, %88 : vector<8x128xf32>
    %c2_i32 = arith.constant 2 : i32
    %c8_i32_39 = arith.constant 8 : i32
    %90 = arith.muli %c2_i32, %c8_i32_39 : i32
    %91 = tpu.assume_multiple %90, 8 : i32
    %92 = arith.index_cast %91 : i32 to index
    %c0_40 = arith.constant 0 : index
    %93 = vector.load %arg8[%92, %c0_40] : memref<64x512xf32, #tpu.memory_space<vmem>>, vector<8x512xf32>
    %94 = arith.truncf %89 : vector<8x128xf32> to vector<8x128xbf16>
    %cst_41 = arith.constant dense<0.000000e+00> : vector<8x512xf32>
    %95 = tpu.matmul %94, %11, %cst_41 {dimension_numbers = #tpu.dot_dimension_numbers<[1], [0], [0], [1], [0, 0, 1, 1], [], []>} : vector<8x128xbf16>, vector<128x512xbf16>, vector<8x512xf32> -> vector<8x512xf32>
    %96 = arith.addf %93, %95 : vector<8x512xf32>
    %97 = vector.extract_strided_slice %96 {offsets = [0, 0], sizes = [8, 128], strides = [1, 1]} : vector<8x512xf32> to vector<8x128xf32>
    %cst_42 = arith.constant 5.000000e-01 : f32
    %98 = vector.broadcast %cst_42 : f32 to vector<8x128xf32>
    %99 = arith.mulf %98, %97 : vector<8x128xf32>
    %100 = math.tanh %99 : vector<8x128xf32>
    %cst_43 = arith.constant 1.000000e+00 : f32
    %101 = vector.broadcast %cst_43 : f32 to vector<8x128xf32>
    %102 = arith.addf %100, %101 : vector<8x128xf32>
    %cst_44 = arith.constant 5.000000e-01 : f32
    %103 = vector.broadcast %cst_44 : f32 to vector<8x128xf32>
    %104 = arith.mulf %103, %102 : vector<8x128xf32>
    %105 = vector.extract_strided_slice %96 {offsets = [0, 128], sizes = [8, 128], strides = [1, 1]} : vector<8x512xf32> to vector<8x128xf32>
    %cst_45 = arith.constant 5.000000e-01 : f32
    %106 = vector.broadcast %cst_45 : f32 to vector<8x128xf32>
    %107 = arith.mulf %106, %105 : vector<8x128xf32>
    %108 = math.tanh %107 : vector<8x128xf32>
    %cst_46 = arith.constant 1.000000e+00 : f32
    %109 = vector.broadcast %cst_46 : f32 to vector<8x128xf32>
    %110 = arith.addf %108, %109 : vector<8x128xf32>
    %cst_47 = arith.constant 5.000000e-01 : f32
    %111 = vector.broadcast %cst_47 : f32 to vector<8x128xf32>
    %112 = arith.mulf %111, %110 : vector<8x128xf32>
    %113 = vector.extract_strided_slice %96 {offsets = [0, 256], sizes = [8, 128], strides = [1, 1]} : vector<8x512xf32> to vector<8x128xf32>
    %114 = math.tanh %113 : vector<8x128xf32>
    %115 = vector.extract_strided_slice %96 {offsets = [0, 384], sizes = [8, 128], strides = [1, 1]} : vector<8x512xf32> to vector<8x128xf32>
    %cst_48 = arith.constant 5.000000e-01 : f32
    %116 = vector.broadcast %cst_48 : f32 to vector<8x128xf32>
    %117 = arith.mulf %116, %115 : vector<8x128xf32>
    %118 = math.tanh %117 : vector<8x128xf32>
    %cst_49 = arith.constant 1.000000e+00 : f32
    %119 = vector.broadcast %cst_49 : f32 to vector<8x128xf32>
    %120 = arith.addf %118, %119 : vector<8x128xf32>
    %cst_50 = arith.constant 5.000000e-01 : f32
    %121 = vector.broadcast %cst_50 : f32 to vector<8x128xf32>
    %122 = arith.mulf %121, %120 : vector<8x128xf32>
    %123 = arith.mulf %112, %87 : vector<8x128xf32>
    %124 = arith.mulf %104, %114 : vector<8x128xf32>
    %125 = arith.addf %123, %124 : vector<8x128xf32>
    %126 = math.tanh %125 : vector<8x128xf32>
    %127 = arith.mulf %122, %126 : vector<8x128xf32>
    %c3_i32 = arith.constant 3 : i32
    %c8_i32_51 = arith.constant 8 : i32
    %128 = arith.muli %c3_i32, %c8_i32_51 : i32
    %129 = tpu.assume_multiple %128, 8 : i32
    %130 = arith.index_cast %129 : i32 to index
    %c0_52 = arith.constant 0 : index
    %131 = vector.load %arg8[%130, %c0_52] : memref<64x512xf32, #tpu.memory_space<vmem>>, vector<8x512xf32>
    %132 = arith.truncf %127 : vector<8x128xf32> to vector<8x128xbf16>
    %cst_53 = arith.constant dense<0.000000e+00> : vector<8x512xf32>
    %133 = tpu.matmul %132, %11, %cst_53 {dimension_numbers = #tpu.dot_dimension_numbers<[1], [0], [0], [1], [0, 0, 1, 1], [], []>} : vector<8x128xbf16>, vector<128x512xbf16>, vector<8x512xf32> -> vector<8x512xf32>
    %134 = arith.addf %131, %133 : vector<8x512xf32>
    %135 = vector.extract_strided_slice %134 {offsets = [0, 0], sizes = [8, 128], strides = [1, 1]} : vector<8x512xf32> to vector<8x128xf32>
    %cst_54 = arith.constant 5.000000e-01 : f32
    %136 = vector.broadcast %cst_54 : f32 to vector<8x128xf32>
    %137 = arith.mulf %136, %135 : vector<8x128xf32>
    %138 = math.tanh %137 : vector<8x128xf32>
    %cst_55 = arith.constant 1.000000e+00 : f32
    %139 = vector.broadcast %cst_55 : f32 to vector<8x128xf32>
    %140 = arith.addf %138, %139 : vector<8x128xf32>
    %cst_56 = arith.constant 5.000000e-01 : f32
    %141 = vector.broadcast %cst_56 : f32 to vector<8x128xf32>
    %142 = arith.mulf %141, %140 : vector<8x128xf32>
    %143 = vector.extract_strided_slice %134 {offsets = [0, 128], sizes = [8, 128], strides = [1, 1]} : vector<8x512xf32> to vector<8x128xf32>
    %cst_57 = arith.constant 5.000000e-01 : f32
    %144 = vector.broadcast %cst_57 : f32 to vector<8x128xf32>
    %145 = arith.mulf %144, %143 : vector<8x128xf32>
    %146 = math.tanh %145 : vector<8x128xf32>
    %cst_58 = arith.constant 1.000000e+00 : f32
    %147 = vector.broadcast %cst_58 : f32 to vector<8x128xf32>
    %148 = arith.addf %146, %147 : vector<8x128xf32>
    %cst_59 = arith.constant 5.000000e-01 : f32
    %149 = vector.broadcast %cst_59 : f32 to vector<8x128xf32>
    %150 = arith.mulf %149, %148 : vector<8x128xf32>
    %151 = vector.extract_strided_slice %134 {offsets = [0, 256], sizes = [8, 128], strides = [1, 1]} : vector<8x512xf32> to vector<8x128xf32>
    %152 = math.tanh %151 : vector<8x128xf32>
    %153 = vector.extract_strided_slice %134 {offsets = [0, 384], sizes = [8, 128], strides = [1, 1]} : vector<8x512xf32> to vector<8x128xf32>
    %cst_60 = arith.constant 5.000000e-01 : f32
    %154 = vector.broadcast %cst_60 : f32 to vector<8x128xf32>
    %155 = arith.mulf %154, %153 : vector<8x128xf32>
    %156 = math.tanh %155 : vector<8x128xf32>
    %cst_61 = arith.constant 1.000000e+00 : f32
    %157 = vector.broadcast %cst_61 : f32 to vector<8x128xf32>
    %158 = arith.addf %156, %157 : vector<8x128xf32>
    %cst_62 = arith.constant 5.000000e-01 : f32
    %159 = vector.broadcast %cst_62 : f32 to vector<8x128xf32>
    %160 = arith.mulf %159, %158 : vector<8x128xf32>
    %161 = arith.mulf %150, %125 : vector<8x128xf32>
    %162 = arith.mulf %142, %152 : vector<8x128xf32>
    %163 = arith.addf %161, %162 : vector<8x128xf32>
    %164 = math.tanh %163 : vector<8x128xf32>
    %165 = arith.mulf %160, %164 : vector<8x128xf32>
    %c4_i32 = arith.constant 4 : i32
    %c8_i32_63 = arith.constant 8 : i32
    %166 = arith.muli %c4_i32, %c8_i32_63 : i32
    %167 = tpu.assume_multiple %166, 8 : i32
    %168 = arith.index_cast %167 : i32 to index
    %c0_64 = arith.constant 0 : index
    %169 = vector.load %arg8[%168, %c0_64] : memref<64x512xf32, #tpu.memory_space<vmem>>, vector<8x512xf32>
    %170 = arith.truncf %165 : vector<8x128xf32> to vector<8x128xbf16>
    %cst_65 = arith.constant dense<0.000000e+00> : vector<8x512xf32>
    %171 = tpu.matmul %170, %11, %cst_65 {dimension_numbers = #tpu.dot_dimension_numbers<[1], [0], [0], [1], [0, 0, 1, 1], [], []>} : vector<8x128xbf16>, vector<128x512xbf16>, vector<8x512xf32> -> vector<8x512xf32>
    %172 = arith.addf %169, %171 : vector<8x512xf32>
    %173 = vector.extract_strided_slice %172 {offsets = [0, 0], sizes = [8, 128], strides = [1, 1]} : vector<8x512xf32> to vector<8x128xf32>
    %cst_66 = arith.constant 5.000000e-01 : f32
    %174 = vector.broadcast %cst_66 : f32 to vector<8x128xf32>
    %175 = arith.mulf %174, %173 : vector<8x128xf32>
    %176 = math.tanh %175 : vector<8x128xf32>
    %cst_67 = arith.constant 1.000000e+00 : f32
    %177 = vector.broadcast %cst_67 : f32 to vector<8x128xf32>
    %178 = arith.addf %176, %177 : vector<8x128xf32>
    %cst_68 = arith.constant 5.000000e-01 : f32
    %179 = vector.broadcast %cst_68 : f32 to vector<8x128xf32>
    %180 = arith.mulf %179, %178 : vector<8x128xf32>
    %181 = vector.extract_strided_slice %172 {offsets = [0, 128], sizes = [8, 128], strides = [1, 1]} : vector<8x512xf32> to vector<8x128xf32>
    %cst_69 = arith.constant 5.000000e-01 : f32
    %182 = vector.broadcast %cst_69 : f32 to vector<8x128xf32>
    %183 = arith.mulf %182, %181 : vector<8x128xf32>
    %184 = math.tanh %183 : vector<8x128xf32>
    %cst_70 = arith.constant 1.000000e+00 : f32
    %185 = vector.broadcast %cst_70 : f32 to vector<8x128xf32>
    %186 = arith.addf %184, %185 : vector<8x128xf32>
    %cst_71 = arith.constant 5.000000e-01 : f32
    %187 = vector.broadcast %cst_71 : f32 to vector<8x128xf32>
    %188 = arith.mulf %187, %186 : vector<8x128xf32>
    %189 = vector.extract_strided_slice %172 {offsets = [0, 256], sizes = [8, 128], strides = [1, 1]} : vector<8x512xf32> to vector<8x128xf32>
    %190 = math.tanh %189 : vector<8x128xf32>
    %191 = vector.extract_strided_slice %172 {offsets = [0, 384], sizes = [8, 128], strides = [1, 1]} : vector<8x512xf32> to vector<8x128xf32>
    %cst_72 = arith.constant 5.000000e-01 : f32
    %192 = vector.broadcast %cst_72 : f32 to vector<8x128xf32>
    %193 = arith.mulf %192, %191 : vector<8x128xf32>
    %194 = math.tanh %193 : vector<8x128xf32>
    %cst_73 = arith.constant 1.000000e+00 : f32
    %195 = vector.broadcast %cst_73 : f32 to vector<8x128xf32>
    %196 = arith.addf %194, %195 : vector<8x128xf32>
    %cst_74 = arith.constant 5.000000e-01 : f32
    %197 = vector.broadcast %cst_74 : f32 to vector<8x128xf32>
    %198 = arith.mulf %197, %196 : vector<8x128xf32>
    %199 = arith.mulf %188, %163 : vector<8x128xf32>
    %200 = arith.mulf %180, %190 : vector<8x128xf32>
    %201 = arith.addf %199, %200 : vector<8x128xf32>
    %202 = math.tanh %201 : vector<8x128xf32>
    %203 = arith.mulf %198, %202 : vector<8x128xf32>
    %c5_i32 = arith.constant 5 : i32
    %c8_i32_75 = arith.constant 8 : i32
    %204 = arith.muli %c5_i32, %c8_i32_75 : i32
    %205 = tpu.assume_multiple %204, 8 : i32
    %206 = arith.index_cast %205 : i32 to index
    %c0_76 = arith.constant 0 : index
    %207 = vector.load %arg8[%206, %c0_76] : memref<64x512xf32, #tpu.memory_space<vmem>>, vector<8x512xf32>
    %208 = arith.truncf %203 : vector<8x128xf32> to vector<8x128xbf16>
    %cst_77 = arith.constant dense<0.000000e+00> : vector<8x512xf32>
    %209 = tpu.matmul %208, %11, %cst_77 {dimension_numbers = #tpu.dot_dimension_numbers<[1], [0], [0], [1], [0, 0, 1, 1], [], []>} : vector<8x128xbf16>, vector<128x512xbf16>, vector<8x512xf32> -> vector<8x512xf32>
    %210 = arith.addf %207, %209 : vector<8x512xf32>
    %211 = vector.extract_strided_slice %210 {offsets = [0, 0], sizes = [8, 128], strides = [1, 1]} : vector<8x512xf32> to vector<8x128xf32>
    %cst_78 = arith.constant 5.000000e-01 : f32
    %212 = vector.broadcast %cst_78 : f32 to vector<8x128xf32>
    %213 = arith.mulf %212, %211 : vector<8x128xf32>
    %214 = math.tanh %213 : vector<8x128xf32>
    %cst_79 = arith.constant 1.000000e+00 : f32
    %215 = vector.broadcast %cst_79 : f32 to vector<8x128xf32>
    %216 = arith.addf %214, %215 : vector<8x128xf32>
    %cst_80 = arith.constant 5.000000e-01 : f32
    %217 = vector.broadcast %cst_80 : f32 to vector<8x128xf32>
    %218 = arith.mulf %217, %216 : vector<8x128xf32>
    %219 = vector.extract_strided_slice %210 {offsets = [0, 128], sizes = [8, 128], strides = [1, 1]} : vector<8x512xf32> to vector<8x128xf32>
    %cst_81 = arith.constant 5.000000e-01 : f32
    %220 = vector.broadcast %cst_81 : f32 to vector<8x128xf32>
    %221 = arith.mulf %220, %219 : vector<8x128xf32>
    %222 = math.tanh %221 : vector<8x128xf32>
    %cst_82 = arith.constant 1.000000e+00 : f32
    %223 = vector.broadcast %cst_82 : f32 to vector<8x128xf32>
    %224 = arith.addf %222, %223 : vector<8x128xf32>
    %cst_83 = arith.constant 5.000000e-01 : f32
    %225 = vector.broadcast %cst_83 : f32 to vector<8x128xf32>
    %226 = arith.mulf %225, %224 : vector<8x128xf32>
    %227 = vector.extract_strided_slice %210 {offsets = [0, 256], sizes = [8, 128], strides = [1, 1]} : vector<8x512xf32> to vector<8x128xf32>
    %228 = math.tanh %227 : vector<8x128xf32>
    %229 = vector.extract_strided_slice %210 {offsets = [0, 384], sizes = [8, 128], strides = [1, 1]} : vector<8x512xf32> to vector<8x128xf32>
    %cst_84 = arith.constant 5.000000e-01 : f32
    %230 = vector.broadcast %cst_84 : f32 to vector<8x128xf32>
    %231 = arith.mulf %230, %229 : vector<8x128xf32>
    %232 = math.tanh %231 : vector<8x128xf32>
    %cst_85 = arith.constant 1.000000e+00 : f32
    %233 = vector.broadcast %cst_85 : f32 to vector<8x128xf32>
    %234 = arith.addf %232, %233 : vector<8x128xf32>
    %cst_86 = arith.constant 5.000000e-01 : f32
    %235 = vector.broadcast %cst_86 : f32 to vector<8x128xf32>
    %236 = arith.mulf %235, %234 : vector<8x128xf32>
    %237 = arith.mulf %226, %201 : vector<8x128xf32>
    %238 = arith.mulf %218, %228 : vector<8x128xf32>
    %239 = arith.addf %237, %238 : vector<8x128xf32>
    %240 = math.tanh %239 : vector<8x128xf32>
    %241 = arith.mulf %236, %240 : vector<8x128xf32>
    %c6_i32 = arith.constant 6 : i32
    %c8_i32_87 = arith.constant 8 : i32
    %242 = arith.muli %c6_i32, %c8_i32_87 : i32
    %243 = tpu.assume_multiple %242, 8 : i32
    %244 = arith.index_cast %243 : i32 to index
    %c0_88 = arith.constant 0 : index
    %245 = vector.load %arg8[%244, %c0_88] : memref<64x512xf32, #tpu.memory_space<vmem>>, vector<8x512xf32>
    %246 = arith.truncf %241 : vector<8x128xf32> to vector<8x128xbf16>
    %cst_89 = arith.constant dense<0.000000e+00> : vector<8x512xf32>
    %247 = tpu.matmul %246, %11, %cst_89 {dimension_numbers = #tpu.dot_dimension_numbers<[1], [0], [0], [1], [0, 0, 1, 1], [], []>} : vector<8x128xbf16>, vector<128x512xbf16>, vector<8x512xf32> -> vector<8x512xf32>
    %248 = arith.addf %245, %247 : vector<8x512xf32>
    %249 = vector.extract_strided_slice %248 {offsets = [0, 0], sizes = [8, 128], strides = [1, 1]} : vector<8x512xf32> to vector<8x128xf32>
    %cst_90 = arith.constant 5.000000e-01 : f32
    %250 = vector.broadcast %cst_90 : f32 to vector<8x128xf32>
    %251 = arith.mulf %250, %249 : vector<8x128xf32>
    %252 = math.tanh %251 : vector<8x128xf32>
    %cst_91 = arith.constant 1.000000e+00 : f32
    %253 = vector.broadcast %cst_91 : f32 to vector<8x128xf32>
    %254 = arith.addf %252, %253 : vector<8x128xf32>
    %cst_92 = arith.constant 5.000000e-01 : f32
    %255 = vector.broadcast %cst_92 : f32 to vector<8x128xf32>
    %256 = arith.mulf %255, %254 : vector<8x128xf32>
    %257 = vector.extract_strided_slice %248 {offsets = [0, 128], sizes = [8, 128], strides = [1, 1]} : vector<8x512xf32> to vector<8x128xf32>
    %cst_93 = arith.constant 5.000000e-01 : f32
    %258 = vector.broadcast %cst_93 : f32 to vector<8x128xf32>
    %259 = arith.mulf %258, %257 : vector<8x128xf32>
    %260 = math.tanh %259 : vector<8x128xf32>
    %cst_94 = arith.constant 1.000000e+00 : f32
    %261 = vector.broadcast %cst_94 : f32 to vector<8x128xf32>
    %262 = arith.addf %260, %261 : vector<8x128xf32>
    %cst_95 = arith.constant 5.000000e-01 : f32
    %263 = vector.broadcast %cst_95 : f32 to vector<8x128xf32>
    %264 = arith.mulf %263, %262 : vector<8x128xf32>
    %265 = vector.extract_strided_slice %248 {offsets = [0, 256], sizes = [8, 128], strides = [1, 1]} : vector<8x512xf32> to vector<8x128xf32>
    %266 = math.tanh %265 : vector<8x128xf32>
    %267 = vector.extract_strided_slice %248 {offsets = [0, 384], sizes = [8, 128], strides = [1, 1]} : vector<8x512xf32> to vector<8x128xf32>
    %cst_96 = arith.constant 5.000000e-01 : f32
    %268 = vector.broadcast %cst_96 : f32 to vector<8x128xf32>
    %269 = arith.mulf %268, %267 : vector<8x128xf32>
    %270 = math.tanh %269 : vector<8x128xf32>
    %cst_97 = arith.constant 1.000000e+00 : f32
    %271 = vector.broadcast %cst_97 : f32 to vector<8x128xf32>
    %272 = arith.addf %270, %271 : vector<8x128xf32>
    %cst_98 = arith.constant 5.000000e-01 : f32
    %273 = vector.broadcast %cst_98 : f32 to vector<8x128xf32>
    %274 = arith.mulf %273, %272 : vector<8x128xf32>
    %275 = arith.mulf %264, %239 : vector<8x128xf32>
    %276 = arith.mulf %256, %266 : vector<8x128xf32>
    %277 = arith.addf %275, %276 : vector<8x128xf32>
    %278 = math.tanh %277 : vector<8x128xf32>
    %279 = arith.mulf %274, %278 : vector<8x128xf32>
    %c7_i32 = arith.constant 7 : i32
    %c8_i32_99 = arith.constant 8 : i32
    %280 = arith.muli %c7_i32, %c8_i32_99 : i32
    %281 = tpu.assume_multiple %280, 8 : i32
    %282 = arith.index_cast %281 : i32 to index
    %c0_100 = arith.constant 0 : index
    %283 = vector.load %arg8[%282, %c0_100] : memref<64x512xf32, #tpu.memory_space<vmem>>, vector<8x512xf32>
    %284 = arith.truncf %279 : vector<8x128xf32> to vector<8x128xbf16>
    %cst_101 = arith.constant dense<0.000000e+00> : vector<8x512xf32>
    %285 = tpu.matmul %284, %11, %cst_101 {dimension_numbers = #tpu.dot_dimension_numbers<[1], [0], [0], [1], [0, 0, 1, 1], [], []>} : vector<8x128xbf16>, vector<128x512xbf16>, vector<8x512xf32> -> vector<8x512xf32>
    %286 = arith.addf %283, %285 : vector<8x512xf32>
    %287 = vector.extract_strided_slice %286 {offsets = [0, 0], sizes = [8, 128], strides = [1, 1]} : vector<8x512xf32> to vector<8x128xf32>
    %cst_102 = arith.constant 5.000000e-01 : f32
    %288 = vector.broadcast %cst_102 : f32 to vector<8x128xf32>
    %289 = arith.mulf %288, %287 : vector<8x128xf32>
    %290 = math.tanh %289 : vector<8x128xf32>
    %cst_103 = arith.constant 1.000000e+00 : f32
    %291 = vector.broadcast %cst_103 : f32 to vector<8x128xf32>
    %292 = arith.addf %290, %291 : vector<8x128xf32>
    %cst_104 = arith.constant 5.000000e-01 : f32
    %293 = vector.broadcast %cst_104 : f32 to vector<8x128xf32>
    %294 = arith.mulf %293, %292 : vector<8x128xf32>
    %295 = vector.extract_strided_slice %286 {offsets = [0, 128], sizes = [8, 128], strides = [1, 1]} : vector<8x512xf32> to vector<8x128xf32>
    %cst_105 = arith.constant 5.000000e-01 : f32
    %296 = vector.broadcast %cst_105 : f32 to vector<8x128xf32>
    %297 = arith.mulf %296, %295 : vector<8x128xf32>
    %298 = math.tanh %297 : vector<8x128xf32>
    %cst_106 = arith.constant 1.000000e+00 : f32
    %299 = vector.broadcast %cst_106 : f32 to vector<8x128xf32>
    %300 = arith.addf %298, %299 : vector<8x128xf32>
    %cst_107 = arith.constant 5.000000e-01 : f32
    %301 = vector.broadcast %cst_107 : f32 to vector<8x128xf32>
    %302 = arith.mulf %301, %300 : vector<8x128xf32>
    %303 = vector.extract_strided_slice %286 {offsets = [0, 256], sizes = [8, 128], strides = [1, 1]} : vector<8x512xf32> to vector<8x128xf32>
    %304 = math.tanh %303 : vector<8x128xf32>
    %305 = vector.extract_strided_slice %286 {offsets = [0, 384], sizes = [8, 128], strides = [1, 1]} : vector<8x512xf32> to vector<8x128xf32>
    %cst_108 = arith.constant 5.000000e-01 : f32
    %306 = vector.broadcast %cst_108 : f32 to vector<8x128xf32>
    %307 = arith.mulf %306, %305 : vector<8x128xf32>
    %308 = math.tanh %307 : vector<8x128xf32>
    %cst_109 = arith.constant 1.000000e+00 : f32
    %309 = vector.broadcast %cst_109 : f32 to vector<8x128xf32>
    %310 = arith.addf %308, %309 : vector<8x128xf32>
    %cst_110 = arith.constant 5.000000e-01 : f32
    %311 = vector.broadcast %cst_110 : f32 to vector<8x128xf32>
    %312 = arith.mulf %311, %310 : vector<8x128xf32>
    %313 = arith.mulf %302, %277 : vector<8x128xf32>
    %314 = arith.mulf %294, %304 : vector<8x128xf32>
    %315 = arith.addf %313, %314 : vector<8x128xf32>
    %316 = math.tanh %315 : vector<8x128xf32>
    %317 = arith.mulf %312, %316 : vector<8x128xf32>
    %c8_i32_111 = arith.constant 8 : i32
    %c0_112 = arith.constant 0 : index
    %c0_113 = arith.constant 0 : index
    %318 = vector.load %arg6[%c0_112, %c0_113] : memref<8x128xf32, #tpu.memory_space<vmem>>, vector<8x128xf32>
    tpu.vector_store %arg6[%c0_112, %c0_113], %317 {strides = array<i32>} : memref<8x128xf32, #tpu.memory_space<vmem>>, vector<8x128xf32>,
    %c0_114 = arith.constant 0 : index
    %c0_115 = arith.constant 0 : index
    %319 = vector.load %arg7[%c0_114, %c0_115] : memref<8x128xf32, #tpu.memory_space<vmem>>, vector<8x128xf32>
    tpu.vector_store %arg7[%c0_114, %c0_115], %315 {strides = array<i32>} : memref<8x128xf32, #tpu.memory_space<vmem>>, vector<8x128xf32>,
    return
  }
  func.func @transform_0(%arg0: i32, %arg1: i32) -> (i32, i32, i32) {
    %c0_i32 = arith.constant 0 : i32
    %c0_i32_0 = arith.constant 0 : i32
    return %arg0, %arg1, %c0_i32 : i32, i32, i32
  }
  func.func @transform_1(%arg0: i32, %arg1: i32) -> (i32, i32) {
    %c0_i32 = arith.constant 0 : i32
    %c0_i32_0 = arith.constant 0 : i32
    %c0_i32_1 = arith.constant 0 : i32
    return %c0_i32, %c0_i32_0 : i32, i32
  }
  func.func @transform_2(%arg0: i32, %arg1: i32) -> (i32, i32) {
    %c0_i32 = arith.constant 0 : i32
    %c0_i32_0 = arith.constant 0 : i32
    %c0_i32_1 = arith.constant 0 : i32
    return %c0_i32, %c0_i32_0 : i32, i32
  }
  func.func @transform_3(%arg0: i32, %arg1: i32) -> (i32, i32) {
    %c0_i32 = arith.constant 0 : i32
    %c0_i32_0 = arith.constant 0 : i32
    %c0_i32_1 = arith.constant 0 : i32
    return %c0_i32, %c0_i32_0 : i32, i32
  }
  func.func @transform_4(%arg0: i32, %arg1: i32) -> (i32, i32) {
    %c0_i32 = arith.constant 0 : i32
    %c0_i32_0 = arith.constant 0 : i32
    return %arg0, %c0_i32 : i32, i32
  }
  func.func @transform_5(%arg0: i32, %arg1: i32) -> (i32, i32) {
    %c0_i32 = arith.constant 0 : i32
    %c0_i32_0 = arith.constant 0 : i32
    return %arg0, %c0_i32 : i32, i32
  }
}

</mosaic_0001>

<bundles_post_ra>
// kernel: tpu_custom_call.1
= control target key start
LH: loop header
LB: loop body
LE: loop exit
PB: predicated region body
PF: predicated region fallthrough
CT: control target
= control target key end

     0   :  { %11 = vsyncpa [#allocation4], 0  ;;  %s2629_s0 = inlined_call_operand.hbm [shape: bf16[1,64,128], index: 0, kind: input, shape index: {}]   ;;  %s2630_s1 = inlined_call_operand.hbm [shape: bf16[128,512], index: 1, kind: input, shape index: {}]   ;;  %s2631_s2 = inlined_call_operand.hbm [shape: bf16[128,512], index: 2, kind: input, shape index: {}]   ;;  %s2632_s3 = inlined_call_operand.vmem [shape: f32[1,512], index: 3, kind: input, shape index: {}]   ;;  %s2633_s4 = inlined_call_operand.hbm [shape: f32[8,128], index: 4, kind: output, shape index: {0}]   ;;  %s2634_s5 = inlined_call_operand.hbm [shape: f32[8,128], index: 5, kind: output, shape index: {1}]  }
   0x1   :  { %12 = vsyncpa [#allocation7], 0 }
   0x2   :  { %13 = vsyncpa [#allocation5], 0 }
   0x3   :  { %14 = vsyncpa [#allocation11], 0  ;;  %s2031_s18 = smov [#allocation6]   ;;  %s1913_s22 = scalar_lea.hbm %s2630_s1, 4096 }
   0x4   :  { %s32_s19 = sshll.u32 %s2031_s18, 4  ;;  %p1914_p0 = scmp.ne.s32.totalorder %s2630_s1, %s1913_s22  ;;  %s33_s19 = int_to_ptr.vmem [resolvable:$true] %s32_s19 }
   0x5   :  { %p1917_p1 = scmp.lt.u32.totalorder %s1913_s22, %s2630_s1 }
   0x7   :  { %p1919_p2 = pnand %p1917_p1, %p1914_p0 }
   0x9   :  { %1922 = shalt.err (!%p1919_p2)
}
   0xa   :  { %s1923_s27 = scalar_lea.vmem %s33_s19, 4096  ;;  %p1928_p4 = scmp.lt.s32.totalorder %s33_s19, %s33_s19 }
   0xb   :  { %p1924_p3 = scmp.ne.s32.totalorder %s33_s19, %s1923_s27  ;;  %p1929_p5 = scmp.lt.s32.totalorder %s1923_s27, %s1923_s27 }
   0xd   :  { %p1930_p6 = por %p1929_p5, %p1928_p4 }
   0xf   :  { %p1931_p7 = pnand %p1930_p6, %p1924_p3 }
  0x11   :  { %1934 = shalt.err (!%p1931_p7)
}
  0x12   :  { %s2032_s28 = smov 256   ;;  %s2033_s29 = smov 16  }
  0x13   :  { %38 = dma.hbm_to_vmem [thread:$0]  %s2630_s1, 4096, %s33_s19, [#allocation7], %s2032_s28, %s2032_s28, %s2033_s29  }
  0x14   :  { %s2034_s7 = smov [#allocation3]   ;;  %s1935_s11 = scalar_lea.hbm %s2629_s0, 512 }
  0x15   :  { %s20_s8 = sshll.u32 %s2034_s7, 4  ;;  %p1936_p8 = scmp.ne.s32.totalorder %s2629_s0, %s1935_s11  ;;  %s21_s8 = int_to_ptr.vmem [resolvable:$true] %s20_s8 }
  0x16   :  { %p1939_p9 = scmp.lt.u32.totalorder %s1935_s11, %s2629_s0 }
  0x18   :  { %p1941_p10 = pnand %p1939_p9, %p1936_p8 }
  0x1a   :  { %1944 = shalt.err (!%p1941_p10)
}
  0x1b   :  { %s1945_s16 = scalar_lea.vmem %s21_s8, 512  ;;  %p1950_p12 = scmp.lt.s32.totalorder %s21_s8, %s21_s8 }
  0x1c   :  { %p1946_p11 = scmp.ne.s32.totalorder %s21_s8, %s1945_s16  ;;  %p1951_p13 = scmp.lt.s32.totalorder %s1945_s16, %s1945_s16 }
  0x1e   :  { %p1952_p0 = por %p1951_p13, %p1950_p12 }
  0x20   :  { %p1953_p1 = pnand %p1952_p0, %p1946_p11 }
  0x22   :  { %1956 = shalt.err (!%p1953_p1)
}
  0x23   :  { %s2035_s1 = smov 64   ;;  %s2036_s17 = smov 4  }
  0x24   :  { %26 = dma.hbm_to_vmem [thread:$0]  %s2629_s0, 512, %s21_s8, [#allocation4], %s2035_s1, %s2035_s1, %s2036_s17  }
  0x25   :  { %s2037_s20 = smov [#allocation8]   ;;  %s1957_s24 = scalar_lea.hbm %s2631_s2, 4096 }
  0x26   :  { %s44_s21 = sshll.u32 %s2037_s20, 4  ;;  %p1958_p2 = scmp.ne.s32.totalorder %s2631_s2, %s1957_s24  ;;  %s45_s21 = int_to_ptr.vmem [resolvable:$true] %s44_s21 }
  0x27   :  { %p1961_p3 = scmp.lt.u32.totalorder %s1957_s24, %s2631_s2 }
  0x29   :  { %p1963_p4 = pnand %p1961_p3, %p1958_p2 }
  0x2b   :  { %1966 = shalt.err (!%p1963_p4)
}
  0x2c   :  { %s1967_s6 = scalar_lea.vmem %s45_s21, 4096  ;;  %p1972_p6 = scmp.lt.s32.totalorder %s45_s21, %s45_s21 }
  0x2d   :  { %p1968_p5 = scmp.ne.s32.totalorder %s45_s21, %s1967_s6  ;;  %p1973_p7 = scmp.lt.s32.totalorder %s1967_s6, %s1967_s6 }
  0x2f   :  { %p1974_p8 = por %p1973_p7, %p1972_p6 }
  0x31   :  { %p1975_p9 = pnand %p1974_p8, %p1968_p5 }
  0x33   :  { %1978 = shalt.err (!%p1975_p9)
}
  0x34   :  { %50 = dma.hbm_to_vmem [thread:$0]  %s2631_s2, 4096, %s45_s21, [#allocation7], %s2032_s28, %s2032_s28, %s2033_s29  }
  0x35   :  { %2023 = dma.done.wait [#allocation4], 512  }
  0x36   :  { %2024 = vsyncadd [#allocation4], 4294966784 }
  0x37   :  { %2025 = dma.done.wait [#allocation7], 8192  }
  0x38   :  { %2026 = vsyncadd [#allocation7], 4294959104  ;;  %v2635_v0 = vmov 0   ;;  %v1701_v1 = vld [vmem:[#allocation6 + $0x4] ss:$16 sps:$4 sm:$0xff]   ;;  %v1762_v44 = vld [vmem:[#allocation3 + $0x8] sm:$0xff]  }
  0x39   :  { %347 = vmatprep.mubr.bf16.mxu0 %v2635_v0  ;;  %420 = vmatprep.mubr.bf16.mxu1 %v2635_v0  ;;  %v1703_v2 = vld [vmem:[#allocation6 + $0xc] ss:$16 sps:$4 sm:$0xff]   ;;  %v1705_v3 = vld [vmem:[#allocation6] ss:$16 sps:$4 sm:$0xff]   ;;  %v1706_v4 = vld [vmem:[#allocation6 + $0x8] ss:$16 sps:$4 sm:$0xff]  }
  0x3a   :  { %315 = vmatprep.subr.bf16.mxu0 %v1701_v1  ;;  %388 = vmatprep.subr.bf16.mxu1 %v1703_v2  ;;  %v1707_v5 = vld [vmem:[#allocation6 + $0x24] ss:$16 sps:$4 sm:$0xff]   ;;  %v1709_v6 = vld [vmem:[#allocation6 + $0x2c] ss:$16 sps:$4 sm:$0xff]   ;;  %v1711_v7 = vld [vmem:[#allocation6 + $0x20] ss:$16 sps:$4 sm:$0xff]  }
  0x3b   :  { %316 = vmatpush1.bf16.msra.mxu0 %v1705_v3  ;;  %389 = vmatpush1.bf16.msra.mxu1 %v1706_v4  ;;  %v1712_v8 = vld [vmem:[#allocation6 + $0x28] ss:$16 sps:$4 sm:$0xff]   ;;  %v1713_v9 = vld [vmem:[#allocation6 + $0x44] ss:$16 sps:$4 sm:$0xff]   ;;  %v1715_v10 = vld [vmem:[#allocation6 + $0x4c] ss:$16 sps:$4 sm:$0xff]  }
  0x3c   :  { %317 = vmatprep.subr.bf16.mxu0 %v1707_v5  ;;  %390 = vmatprep.subr.bf16.mxu1 %v1709_v6  ;;  %v1717_v11 = vld [vmem:[#allocation6 + $0x40] ss:$16 sps:$4 sm:$0xff]   ;;  %v1718_v12 = vld [vmem:[#allocation6 + $0x48] ss:$16 sps:$4 sm:$0xff]   ;;  %v1719_v13 = vld [vmem:[#allocation6 + $0x64] ss:$16 sps:$4 sm:$0xff]  }
  0x3d   :  { %v1721_v14 = vld [vmem:[#allocation6 + $0x6c] ss:$16 sps:$4 sm:$0xff]   ;;  %v1723_v15 = vld [vmem:[#allocation6 + $0x60] ss:$16 sps:$4 sm:$0xff]   ;;  %v1724_v16 = vld [vmem:[#allocation6 + $0x68] ss:$16 sps:$4 sm:$0xff]  }
  0x3e   :  { %v1725_v17 = vld [vmem:[#allocation6 + $0x84] ss:$16 sps:$4 sm:$0xff]   ;;  %v1727_v18 = vld [vmem:[#allocation6 + $0x8c] ss:$16 sps:$4 sm:$0xff]   ;;  %v1729_v19 = vld [vmem:[#allocation6 + $0x80] ss:$16 sps:$4 sm:$0xff]  }
  0x3f   :  { %318 = vmatpush1.bf16.msra.mxu0 %v1711_v7  ;;  %391 = vmatpush1.bf16.msra.mxu1 %v1712_v8  ;;  %v1730_v20 = vld [vmem:[#allocation6 + $0x88] ss:$16 sps:$4 sm:$0xff]   ;;  %v1731_v21 = vld [vmem:[#allocation6 + $0xa4] ss:$16 sps:$4 sm:$0xff]   ;;  %v1733_v22 = vld [vmem:[#allocation6 + $0xac] ss:$16 sps:$4 sm:$0xff]   ;;  %v111_v7 = vlaneseq }
  0x40   :  { %319 = vmatprep.subr.bf16.mxu0 %v1713_v9  ;;  %392 = vmatprep.subr.bf16.mxu1 %v1715_v10  ;;  %v1735_v23 = vld [vmem:[#allocation6 + $0xa0] ss:$16 sps:$4 sm:$0xff]   ;;  %v1736_v24 = vld [vmem:[#allocation6 + $0xa8] ss:$16 sps:$4 sm:$0xff]   ;;  %v1737_v25 = vld [vmem:[#allocation6 + $0xc4] ss:$16 sps:$4 sm:$0xff]  }
  0x41   :  { %v1739_v26 = vld [vmem:[#allocation6 + $0xcc] ss:$16 sps:$4 sm:$0xff]   ;;  %v1741_v27 = vld [vmem:[#allocation6 + $0xc0] ss:$16 sps:$4 sm:$0xff]   ;;  %v1742_v28 = vld [vmem:[#allocation6 + $0xc8] ss:$16 sps:$4 sm:$0xff]  }
  0x42   :  { %v1743_v29 = vld [vmem:[#allocation6 + $0xe4] ss:$16 sps:$4 sm:$0xff]   ;;  %v1745_v30 = vld [vmem:[#allocation6 + $0xec] ss:$16 sps:$4 sm:$0xff]   ;;  %v1747_v31 = vld [vmem:[#allocation6 + $0xe0] ss:$16 sps:$4 sm:$0xff]  }
  0x43   :  { %320 = vmatpush1.bf16.msra.mxu0 %v1717_v11  ;;  %393 = vmatpush1.bf16.msra.mxu1 %v1718_v12  ;;  %v1748_v32 = vld [vmem:[#allocation6 + $0xe8] ss:$16 sps:$4 sm:$0xff]   ;;  %v2116_v33 = vld [vmem:[#allocation8 + $0x4] ss:$16 sps:$4 sm:$0xff]   ;;  %v2118_v34 = vld [vmem:[#allocation8 + $0xc] ss:$16 sps:$4 sm:$0xff]  }
  0x44   :  { %321 = vmatprep.subr.bf16.mxu0 %v1719_v13  ;;  %394 = vmatprep.subr.bf16.mxu1 %v1721_v14  ;;  %v1749_v35 = vld [vmem:[#allocation3] sm:$0xff]   ;;  %v2122_v37 = vld [vmem:[#allocation8 + $0x8] ss:$16 sps:$4 sm:$0xff]   ;;  %v2128_v39 = vld [vmem:[#allocation8 + $0x2c] ss:$16 sps:$4 sm:$0xff]   ;;  %v2039_v6 = vmov 0.0|0.0  }
  0x45   :  { %v2120_v36 = vld [vmem:[#allocation8] ss:$16 sps:$4 sm:$0xff]   ;;  %v2126_v38 = vld [vmem:[#allocation8 + $0x24] ss:$16 sps:$4 sm:$0xff]   ;;  %v2134_v41 = vld [vmem:[#allocation8 + $0x28] ss:$16 sps:$4 sm:$0xff]  }
  0x46   :  { %v2130_v40 = vld [vmem:[#allocation8 + $0x20] ss:$16 sps:$4 sm:$0xff]   ;;  %v2138_v42 = vld [vmem:[#allocation8 + $0x44] ss:$16 sps:$4 sm:$0xff]   ;;  %v2140_v43 = vld [vmem:[#allocation8 + $0x4c] ss:$16 sps:$4 sm:$0xff]  }
  0x47   :  { %322 = vmatpush1.bf16.msra.mxu0 %v1723_v15  ;;  %395 = vmatpush1.bf16.msra.mxu1 %v1724_v16  ;;  %v2144_v45 = vld [vmem:[#allocation8 + $0x40] ss:$16 sps:$4 sm:$0xff]   ;;  %v2146_v46 = vld [vmem:[#allocation8 + $0x48] ss:$16 sps:$4 sm:$0xff]   ;;  %v2150_v47 = vld [vmem:[#allocation8 + $0x64] ss:$16 sps:$4 sm:$0xff]  }
  0x48   :  { %323 = vmatprep.subr.bf16.mxu0 %v1725_v17  ;;  %396 = vmatprep.subr.bf16.mxu1 %v1727_v18  ;;  %v2154_v48 = vld [vmem:[#allocation8 + $0x6c] ss:$16 sps:$4 sm:$0xff]   ;;  %v2156_v49 = vld [vmem:[#allocation8 + $0x60] ss:$16 sps:$4 sm:$0xff]   ;;  %v2158_v50 = vld [vmem:[#allocation8 + $0x68] ss:$16 sps:$4 sm:$0xff]  }
  0x49   :  { %v2162_v51 = vld [vmem:[#allocation8 + $0x84] ss:$16 sps:$4 sm:$0xff]   ;;  %v2166_v52 = vld [vmem:[#allocation8 + $0x8c] ss:$16 sps:$4 sm:$0xff]   ;;  %v2172_v54 = vld [vmem:[#allocation8 + $0x80] ss:$16 sps:$4 sm:$0xff]  }
  0x4a   :  { %v1775_v53 = vld [vmem:[#allocation3 + $0x10] sm:$0xff]   ;;  %v2174_v55 = vld [vmem:[#allocation8 + $0x88] ss:$16 sps:$4 sm:$0xff]   ;;  %v2180_v57 = vld [vmem:[#allocation8 + $0xac] ss:$16 sps:$4 sm:$0xff]   ;;  %v112_v8 = vshrl.u32 %v111_v7, 7 }
  0x4b   :  { %324 = vmatpush1.bf16.msra.mxu0 %v1729_v19  ;;  %397 = vmatpush1.bf16.msra.mxu1 %v1730_v20  ;;  %v2178_v56 = vld [vmem:[#allocation8 + $0xa4] ss:$16 sps:$4 sm:$0xff]   ;;  %v2184_v58 = vld [vmem:[#allocation8 + $0xa0] ss:$16 sps:$4 sm:$0xff]   ;;  %v2186_v59 = vld [vmem:[#allocation8 + $0xa8] ss:$16 sps:$4 sm:$0xff]  }
  0x4c   :  { %325 = vmatprep.subr.bf16.mxu0 %v1731_v21  ;;  %398 = vmatprep.subr.bf16.mxu1 %v1733_v22  ;;  %v2190_v60 = vld [vmem:[#allocation8 + $0xc4] ss:$16 sps:$4 sm:$0xff]   ;;  %v2192_v61 = vld [vmem:[#allocation8 + $0xcc] ss:$16 sps:$4 sm:$0xff]   ;;  %v2198_v63 = vld [vmem:[#allocation8 + $0xc0] ss:$16 sps:$4 sm:$0xff]  }
  0x4d   :  { %v1788_v62 = vld [vmem:[#allocation3 + $0x18] sm:$0xff]   ;;  %v2204_v2 = vld [vmem:[#allocation8 + $0xe4] ss:$16 sps:$4 sm:$0xff]   ;;  %v2210_v4 = vld [vmem:[#allocation8 + $0xe0] ss:$16 sps:$4 sm:$0xff]   ;;  %v121_v9 = vsub.s32 2, %v112_v8 }
  0x4e   :  { %v2200_v1 = vld [vmem:[#allocation8 + $0xc8] ss:$16 sps:$4 sm:$0xff]   ;;  %v2206_v3 = vld [vmem:[#allocation8 + $0xec] ss:$16 sps:$4 sm:$0xff]   ;;  %v125_v10 = vsub.s32 3, %v112_v8  ;;  %v113_v11 = vsub.s32 0, %v112_v8 }
  0x4f   :  { %326 = vmatpush1.bf16.msra.mxu0 %v1735_v23  ;;  %399 = vmatpush1.bf16.msra.mxu1 %v1736_v24  ;;  %v2212_v5 = vld [vmem:[#allocation8 + $0xe8] ss:$16 sps:$4 sm:$0xff]   ;;  %v109_v12 = vld [vmem:[%s2632_s3] sm:$0xf]  ;;  %v117_v13 = vsub.s32 1, %v112_v8  ;;  %s2040_s3 = smov [#allocation10]  }
  0x50   :  { %327 = vmatprep.subr.bf16.mxu0 %v1737_v25  ;;  %400 = vmatprep.subr.bf16.mxu1 %v1739_v26  ;;  %v2259_v14 = vrot.slane %v109_v12, %v121_v9  ;;  %v2265_v17 = vrot.slane %v109_v12, %v125_v10  ;;  %v114_v18 = vrot.slane %v109_v12, %v113_v11  ;;  %s1601_s29 = sshll.u32 %s2040_s3, 4  ;;  %s1602_s29 = int_to_ptr.vmem [resolvable:$true] %s1601_s29 }
  0x51   :  { %v118_v21 = vrot.slane %v109_v12, %v117_v13  ;;  %s1979_s8 = scalar_lea.vmem %s1602_s29, 128  ;;  %p1984_p11 = scmp.lt.s32.totalorder %s1602_s29, %s1602_s29 }
  0x52   :  { %p1980_p10 = scmp.ne.s32.totalorder %s1602_s29, %s1979_s8  ;;  %p1985_p12 = scmp.lt.s32.totalorder %s1979_s8, %s1979_s8 }
  0x53   :  { %328 = vmatpush1.bf16.msra.mxu0 %v1741_v27  ;;  %401 = vmatpush1.bf16.msra.mxu1 %v1742_v28 }
  0x54   :  { %329 = vmatprep.subr.bf16.mxu0 %v1743_v29  ;;  %402 = vmatprep.subr.bf16.mxu1 %v1745_v30  ;;  %p1986_p13 = por %p1985_p12, %p1984_p11 }
  0x56   :  { %p1987_p0 = pnand %p1986_p13, %p1980_p10 }
  0x57   :  { %330 = vmatpush1.bf16.msra.mxu0 %v1747_v31  ;;  %403 = vmatpush1.bf16.msra.mxu1 %v1748_v32 }
  0x58   :  { %695 = vmatprep.subr.bf16.mxu0 %v2116_v33  ;;  %736 = vmatprep.subr.bf16.mxu1 %v2118_v34 }
  0x5a   :  { %348 = vmatmul.mubr.bf16.vlgmr.msra.gmra.mrb[0].mxu0 %v1749_v35  ;;  %421 = vmatmul.mubr.bf16.vlgmr.msra.gmra.mrb[0].mxu1 %v1749_v35 }
  0x5b   :  { %696 = vmatpush1.bf16.msra.mxu0 %v2120_v36  ;;  %737 = vmatpush1.bf16.msra.mxu1 %v2122_v37 }
  0x5c   :  { %697 = vmatprep.subr.bf16.mxu0 %v2126_v38  ;;  %738 = vmatprep.subr.bf16.mxu1 %v2128_v39 }
  0x5d   :  { %357 = vmatprep.mubr.bf16.mxu0 %v2635_v0  ;;  %430 = vmatprep.mubr.bf16.mxu1 %v2635_v0 }
  0x5f   :  { %698 = vmatpush1.bf16.msra.mxu0 %v2130_v40  ;;  %739 = vmatpush1.bf16.msra.mxu1 %v2134_v41 }
  0x60   :  { %699 = vmatprep.subr.bf16.mxu0 %v2138_v42  ;;  %740 = vmatprep.subr.bf16.mxu1 %v2140_v43 }
  0x62   :  { %358 = vmatmul.mubr.bf16.gmra.mrb[4].mxu0 %v1762_v44  ;;  %431 = vmatmul.mubr.bf16.gmra.mrb[4].mxu1 %v1762_v44 }
  0x63   :  { %700 = vmatpush1.bf16.msra.mxu0 %v2144_v45  ;;  %741 = vmatpush1.bf16.msra.mxu1 %v2146_v46 }
  0x64   :  { %701 = vmatprep.subr.bf16.mxu0 %v2150_v47  ;;  %742 = vmatprep.subr.bf16.mxu1 %v2154_v48 }
  0x65   :  { %367 = vmatprep.mubr.bf16.mxu0 %v2635_v0  ;;  %440 = vmatprep.mubr.bf16.mxu1 %v2635_v0 }
  0x67   :  { %702 = vmatpush1.bf16.msra.mxu0 %v2156_v49  ;;  %743 = vmatpush1.bf16.msra.mxu1 %v2158_v50 }
  0x68   :  { %703 = vmatprep.subr.bf16.mxu0 %v2162_v51  ;;  %744 = vmatprep.subr.bf16.mxu1 %v2166_v52 }
  0x6a   :  { %368 = vmatmul.mubr.bf16.gmra.mrb[8].mxu0 %v1775_v53  ;;  %441 = vmatmul.mubr.bf16.gmra.mrb[8].mxu1 %v1775_v53 }
  0x6b   :  { %704 = vmatpush1.bf16.msra.mxu0 %v2172_v54  ;;  %745 = vmatpush1.bf16.msra.mxu1 %v2174_v55 }
  0x6c   :  { %705 = vmatprep.subr.bf16.mxu0 %v2178_v56  ;;  %746 = vmatprep.subr.bf16.mxu1 %v2180_v57 }
  0x6d   :  { %377 = vmatprep.mubr.bf16.mxu0 %v2635_v0  ;;  %450 = vmatprep.mubr.bf16.mxu1 %v2635_v0 }
  0x6f   :  { %706 = vmatpush1.bf16.msra.mxu0 %v2184_v58  ;;  %747 = vmatpush1.bf16.msra.mxu1 %v2186_v59 }
  0x70   :  { %707 = vmatprep.subr.bf16.mxu0 %v2190_v60  ;;  %748 = vmatprep.subr.bf16.mxu1 %v2192_v61 }
  0x72   :  { %378 = vmatmul.mubr.bf16.gmra.mrb[12].mxu0 %v1788_v62  ;;  %451 = vmatmul.mubr.bf16.gmra.mrb[12].mxu1 %v1788_v62 }
  0x73   :  { %708 = vmatpush1.bf16.msra.mxu0 %v2198_v63  ;;  %749 = vmatpush1.bf16.msra.mxu1 %v2200_v1 }
  0x74   :  { %709 = vmatprep.subr.bf16.mxu0 %v2204_v2  ;;  %750 = vmatprep.subr.bf16.mxu1 %v2206_v3 }
  0x75   :  { %727 = vmatprep.mubr.bf16.mxu0 %v2635_v0  ;;  %768 = vmatprep.mubr.bf16.mxu1 %v2635_v0 }
  0x77   :  { %710 = vmatpush1.bf16.msra.mxu0 %v2210_v4  ;;  %751 = vmatpush1.bf16.msra.mxu1 %v2212_v5 }
  0x78   :  { %807 = vmatprep.subr.bf16.mxu0 %v2116_v33  ;;  %848 = vmatprep.subr.bf16.mxu1 %v2118_v34 }
  0x7a   :  { %728 = vmatmul.mubr.bf16.vlgmr.msra.gmra.mrb[16].mxu0 %v2039_v6  ;;  %769 = vmatmul.mubr.bf16.vlgmr.msra.gmra.mrb[16].mxu1 %v2039_v6 }
  0x7b   :  { %808 = vmatpush1.bf16.msra.mxu0 %v2120_v36  ;;  %849 = vmatpush1.bf16.msra.mxu1 %v2122_v37 }
  0x7c   :  { %809 = vmatprep.subr.bf16.mxu0 %v2126_v38  ;;  %850 = vmatprep.subr.bf16.mxu1 %v2128_v39 }
  0x7d   :  { %839 = vmatprep.mubr.bf16.mxu0 %v2635_v0  ;;  %880 = vmatprep.mubr.bf16.mxu1 %v2635_v0 }
  0x7f   :  { %810 = vmatpush1.bf16.msra.mxu0 %v2130_v40  ;;  %851 = vmatpush1.bf16.msra.mxu1 %v2134_v41 }
  0x80   :  { %811 = vmatprep.subr.bf16.mxu0 %v2138_v42  ;;  %852 = vmatprep.subr.bf16.mxu1 %v2140_v43 }
  0x83   :  { %812 = vmatpush1.bf16.msra.mxu0 %v2144_v45  ;;  %853 = vmatpush1.bf16.msra.mxu1 %v2146_v46 }
  0x84   :  { %813 = vmatprep.subr.bf16.mxu0 %v2150_v47  ;;  %854 = vmatprep.subr.bf16.mxu1 %v2154_v48 }
  0x87   :  { %814 = vmatpush1.bf16.msra.mxu0 %v2156_v49  ;;  %855 = vmatpush1.bf16.msra.mxu1 %v2158_v50 }
  0x88   :  { %815 = vmatprep.subr.bf16.mxu0 %v2162_v51  ;;  %856 = vmatprep.subr.bf16.mxu1 %v2166_v52 }
  0x8b   :  { %816 = vmatpush1.bf16.msra.mxu0 %v2172_v54  ;;  %857 = vmatpush1.bf16.msra.mxu1 %v2174_v55 }
  0x8c   :  { %817 = vmatprep.subr.bf16.mxu0 %v2178_v56  ;;  %858 = vmatprep.subr.bf16.mxu1 %v2180_v57 }
  0x8f   :  { %818 = vmatpush1.bf16.msra.mxu0 %v2184_v58  ;;  %859 = vmatpush1.bf16.msra.mxu1 %v2186_v59 }
  0x90   :  { %819 = vmatprep.subr.bf16.mxu0 %v2190_v60  ;;  %860 = vmatprep.subr.bf16.mxu1 %v2192_v61 }
  0x93   :  { %820 = vmatpush1.bf16.msra.mxu0 %v2198_v63  ;;  %861 = vmatpush1.bf16.msra.mxu1 %v2200_v1 }
  0x94   :  { %821 = vmatprep.subr.bf16.mxu0 %v2204_v2  ;;  %862 = vmatprep.subr.bf16.mxu1 %v2206_v3 }
  0x97   :  { %822 = vmatpush1.bf16.msra.mxu0 %v2210_v4  ;;  %863 = vmatpush1.bf16.msra.mxu1 %v2212_v5 }
  0x98   :  { %919 = vmatprep.subr.bf16.mxu0 %v2116_v33  ;;  %960 = vmatprep.subr.bf16.mxu1 %v2118_v34 }
 0x12d   :  { %v2261_v15 = vpop.f32.mrb[0].mxu0  ;;  %v2263_v16 = vpop.f32.mrb[0].mxu1 }
 0x12e   :  { %v351_v19 = vpop.f32.mrb[1].mxu0  ;;  %v424_v20 = vpop.f32.mrb[1].mxu1 }
 0x12f   :  { %v353_v22 = vpop.f32.mrb[2].mxu0  ;;  %v426_v23 = vpop.f32.mrb[2].mxu1 }
 0x130   :  { %v2267_v24 = vadd.f32 %v353_v22, %v114_v18  ;;  %v355_v25 = vpop.f32.mrb[3].mxu0  ;;  %v2270_v26 = vadd.f32 %v426_v23, %v2259_v14  ;;  %v428_v27 = vpop.f32.mrb[3].mxu1 }
 0x131   :  { %v2272_v28 = vadd.f32 %v355_v25, %v118_v21  ;;  %v2275_v29 = vadd.f32 %v428_v27, %v2265_v17 }
 0x135   :  { %v359_v30 = vpop.f32.mrb[4].mxu0  ;;  %v432_v31 = vpop.f32.mrb[4].mxu1 }
 0x136   :  { %v2277_v32 = vadd.f32 %v359_v30, %v114_v18  ;;  %v361_v35 = vpop.f32.mrb[5].mxu0  ;;  %v2280_v44 = vadd.f32 %v432_v31, %v2259_v14  ;;  %v434_v53 = vpop.f32.mrb[5].mxu1 }
 0x137   :  { %v2282_v62 = vadd.f32 %v361_v35, %v118_v21  ;;  %v363_v6 = vpop.f32.mrb[6].mxu0  ;;  %v2285_v7 = vadd.f32 %v434_v53, %v2265_v17  ;;  %v436_v8 = vpop.f32.mrb[6].mxu1 }
 0x138   :  { %v2287_v9 = vadd.f32 %v363_v6, %v114_v18  ;;  %v365_v10 = vpop.f32.mrb[7].mxu0  ;;  %v2290_v11 = vadd.f32 %v436_v8, %v2259_v14  ;;  %v438_v12 = vpop.f32.mrb[7].mxu1 }
 0x139   :  { %2637 = vst [vmem:[#allocation16_spill] sm:$0xff] %v2285_v7  ;;  %v2292_v13 = vadd.f32 %v365_v10, %v118_v21  ;;  %v2295_v22 = vadd.f32 %v438_v12, %v2265_v17 }
 0x13a   :  { %2638 = vst [vmem:[#allocation17_spill] sm:$0xff] %v2287_v9  ;;  %2639 = vst [vmem:[#allocation18_spill] sm:$0xff] %v2290_v11 }
 0x13b   :  { %2640 = vst [vmem:[#allocation19_spill] sm:$0xff] %v2292_v13  ;;  %2641 = vst [vmem:[#allocation20_spill] sm:$0xff] %v2295_v22 }
 0x13d   :  { %v369_v23 = vpop.f32.mrb[8].mxu0  ;;  %v442_v25 = vpop.f32.mrb[8].mxu1 }
 0x13e   :  { %v2297_v27 = vadd.f32 %v369_v23, %v114_v18  ;;  %v371_v30 = vpop.f32.mrb[9].mxu0  ;;  %v2300_v31 = vadd.f32 %v442_v25, %v2259_v14  ;;  %v444_v35 = vpop.f32.mrb[9].mxu1 }
 0x13f   :  { %v2302_v53 = vadd.f32 %v371_v30, %v118_v21  ;;  %v373_v6 = vpop.f32.mrb[10].mxu0  ;;  %v2305_v8 = vadd.f32 %v444_v35, %v2265_v17  ;;  %v446_v10 = vpop.f32.mrb[10].mxu1 }
 0x140   :  { %2642 = vst [vmem:[#allocation21_spill] sm:$0xff] %v2297_v27  ;;  %2643 = vst [vmem:[#allocation22_spill] sm:$0xff] %v2300_v31  ;;  %v2307_v0 = vadd.f32 %v373_v6, %v114_v18  ;;  %v375_v12 = vpop.f32.mrb[11].mxu0  ;;  %v2310_v22 = vadd.f32 %v446_v10, %v2259_v14  ;;  %v448_v23 = vpop.f32.mrb[11].mxu1 }
 0x141   :  { %2644 = vst [vmem:[#allocation23_spill] sm:$0xff] %v2302_v53  ;;  %2645 = vst [vmem:[#allocation24_spill] sm:$0xff] %v2305_v8  ;;  %v2312_v27 = vadd.f32 %v375_v12, %v118_v21  ;;  %v2315_v25 = vadd.f32 %v448_v23, %v2265_v17 }
 0x142   :  { %2646 = vst [vmem:[#allocation25_spill] sm:$0xff] %v2307_v0  ;;  %2647 = vst [vmem:[#allocation26_spill] sm:$0xff] %v2310_v22 }
 0x143   :  { %2648 = vst [vmem:[#allocation27_spill] sm:$0xff] %v2312_v27  ;;  %2649 = vst [vmem:[#allocation28_spill] sm:$0xff] %v2315_v25 }
 0x145   :  { %v379_v31 = vpop.f32.mrb[12].mxu0  ;;  %v452_v30 = vpop.f32.mrb[12].mxu1 }
 0x146   :  { %v2317_v53 = vadd.f32 %v379_v31, %v114_v18  ;;  %v381_v13 = vpop.f32.mrb[13].mxu0  ;;  %v2320_v35 = vadd.f32 %v452_v30, %v2259_v14  ;;  %v454_v6 = vpop.f32.mrb[13].mxu1 }
 0x147   :  { %v2322_v0 = vadd.f32 %v381_v13, %v118_v21  ;;  %v383_v8 = vpop.f32.mrb[14].mxu0  ;;  %v2325_v10 = vadd.f32 %v454_v6, %v2265_v17  ;;  %v456_v12 = vpop.f32.mrb[14].mxu1  ;;  %v350_v13 = vadd.f32 %v2261_v15, %v114_v18  ;;  %v352_v6 = vadd.f32 %v351_v19, %v118_v21 }
 0x148   :  { %2650 = vst [vmem:[#allocation29_spill] sm:$0xff] %v2317_v53  ;;  %2651 = vst [vmem:[#allocation30_spill] sm:$0xff] %v2320_v35  ;;  %v2327_v27 = vadd.f32 %v383_v8, %v114_v18  ;;  %v385_v23 = vpop.f32.mrb[15].mxu0  ;;  %v2330_v25 = vadd.f32 %v456_v12, %v2259_v14  ;;  %v458_v31 = vpop.f32.mrb[15].mxu1 }
 0x149   :  { %2652 = vst [vmem:[#allocation31_spill] sm:$0xff] %v2322_v0  ;;  %2653 = vst [vmem:[#allocation32_spill] sm:$0xff] %v2325_v10  ;;  %v2332_v53 = vadd.f32 %v385_v23, %v118_v21  ;;  %v2335_v30 = vadd.f32 %v458_v31, %v2265_v17  ;;  %v423_v0 = vadd.f32 %v2263_v16, %v2259_v14 }
 0x14a   :  { %2654 = vst [vmem:[#allocation33_spill] sm:$0xff] %v2327_v27  ;;  %2655 = vst [vmem:[#allocation34_spill] sm:$0xff] %v2330_v25  ;;  %v425_v10 = vadd.f32 %v424_v20, %v2265_v17 }
 0x14b   :  { %2656 = vst [vmem:[#allocation35_spill] sm:$0xff] %v2332_v53  ;;  %2657 = vst [vmem:[#allocation36_spill] sm:$0xff] %v2335_v30 }
 0x14d   :  { %v729_v8 = vpop.f32.mrb[16].mxu0  ;;  %v770_v27 = vpop.f32.mrb[16].mxu1 }
 0x14e   :  { %v777_v35 = vadd.f32 %v729_v8, %v350_v13  ;;  %v779_v22 = vadd.f32 %v770_v27, %v423_v0  ;;  %v731_v12 = vpop.f32.mrb[17].mxu0  ;;  %v772_v25 = vpop.f32.mrb[17].mxu1 }
 0x14f   :  { %v778_v11 = vadd.f32 %v731_v12, %v352_v6  ;;  %v780_v23 = vadd.f32 %v772_v25, %v425_v10  ;;  %v733_v53 = vpop.f32.mrb[18].mxu0  ;;  %v774_v9 = vpop.f32.mrb[18].mxu1 }
 0x150   :  { %v781_v31 = vmul.f32 0.5, %v777_v35  ;;  %v734_v30 = vpop.f32.mrb[19].mxu0  ;;  %v775_v7 = vpop.f32.mrb[19].mxu1 }
 0x151   :  { %v785_v15 = vmul.f32 0.5, %v778_v11  ;;  %v790_v14 = vmul.f32 0.5, %v780_v23  ;;  %v2658_v30 = vmov 0  }
 0x152   :  { %1801 = vtanh.f32 %v781_v31 }
 0x153   :  { %1803 = vtanh.f32 %v785_v15 }
 0x154   :  { %1805 = vtanh.f32 %v779_v22 }
 0x155   :  { %1807 = vtanh.f32 %v790_v14 }
 0x15c   :  { %v1802_v16 = vpop.eup %1801 }
 0x15d   :  { %v1804_v17 = vpop.eup %1803  ;;  %v783_v18 = vadd.f32 1.0, %v1802_v16 }
 0x15e   :  { %v787_v19 = vadd.f32 1.0, %v1804_v17  ;;  %v1806_v20 = vpop.eup %1805 }
 0x15f   :  { %v784_v0 = vmul.f32 0.5, %v783_v18  ;;  %v1808_v7 = vpop.eup %1807 }
 0x160   :  { %v788_v21 = vmul.f32 0.5, %v787_v19  ;;  %v792_v9 = vadd.f32 1.0, %v1808_v7 }
 0x161   :  { %v795_v27 = vmul.f32 %v1806_v20, %v784_v0 }
 0x162   :  { %v794_v25 = vmul.f32 0.0, %v788_v21  ;;  %v793_v11 = vmul.f32 0.5, %v792_v9 }
 0x164   :  { %v2341_v53 = vadd.f32 %v795_v27, %v794_v25 }
 0x166   :  { %1809 = vtanh.f32 %v2341_v53 }
 0x170   :  { %v1810_v35 = vpop.eup %1809 }
 0x171   :  { %v798_v22 = vmul.f32 %v1810_v35, %v793_v11 }
 0x173   :  { %v806_v10 = vpack.c.bf16 %v798_v22, %v798_v22 }
 0x175   :  { %840 = vmatmul.mubr.bf16.vlgmr.msra.gmra.mrb[20].mxu0 %v806_v10  ;;  %881 = vmatmul.mubr.bf16.vlgmr.msra.gmra.mrb[20].mxu1 %v806_v10 }
 0x176   :  { %920 = vmatpush1.bf16.msra.mxu0 %v2120_v36  ;;  %961 = vmatpush1.bf16.msra.mxu1 %v2122_v37 }
 0x177   :  { %921 = vmatprep.subr.bf16.mxu0 %v2126_v38  ;;  %962 = vmatprep.subr.bf16.mxu1 %v2128_v39 }
 0x178   :  { %951 = vmatprep.mubr.bf16.mxu0 %v2658_v30  ;;  %992 = vmatprep.mubr.bf16.mxu1 %v2658_v30 }
 0x17a   :  { %922 = vmatpush1.bf16.msra.mxu0 %v2130_v40  ;;  %963 = vmatpush1.bf16.msra.mxu1 %v2134_v41 }
 0x17b   :  { %923 = vmatprep.subr.bf16.mxu0 %v2138_v42  ;;  %964 = vmatprep.subr.bf16.mxu1 %v2140_v43 }
 0x17e   :  { %924 = vmatpush1.bf16.msra.mxu0 %v2144_v45  ;;  %965 = vmatpush1.bf16.msra.mxu1 %v2146_v46 }
 0x17f   :  { %925 = vmatprep.subr.bf16.mxu0 %v2150_v47  ;;  %966 = vmatprep.subr.bf16.mxu1 %v2154_v48 }
 0x182   :  { %926 = vmatpush1.bf16.msra.mxu0 %v2156_v49  ;;  %967 = vmatpush1.bf16.msra.mxu1 %v2158_v50 }
 0x183   :  { %927 = vmatprep.subr.bf16.mxu0 %v2162_v51  ;;  %968 = vmatprep.subr.bf16.mxu1 %v2166_v52 }
 0x186   :  { %928 = vmatpush1.bf16.msra.mxu0 %v2172_v54  ;;  %969 = vmatpush1.bf16.msra.mxu1 %v2174_v55 }
 0x187   :  { %929 = vmatprep.subr.bf16.mxu0 %v2178_v56  ;;  %970 = vmatprep.subr.bf16.mxu1 %v2180_v57 }
 0x18a   :  { %930 = vmatpush1.bf16.msra.mxu0 %v2184_v58  ;;  %971 = vmatpush1.bf16.msra.mxu1 %v2186_v59 }
 0x18b   :  { %931 = vmatprep.subr.bf16.mxu0 %v2190_v60  ;;  %972 = vmatprep.subr.bf16.mxu1 %v2192_v61 }
 0x18e   :  { %932 = vmatpush1.bf16.msra.mxu0 %v2198_v63  ;;  %973 = vmatpush1.bf16.msra.mxu1 %v2200_v1 }
 0x18f   :  { %933 = vmatprep.subr.bf16.mxu0 %v2204_v2  ;;  %974 = vmatprep.subr.bf16.mxu1 %v2206_v3 }
 0x192   :  { %934 = vmatpush1.bf16.msra.mxu0 %v2210_v4  ;;  %975 = vmatpush1.bf16.msra.mxu1 %v2212_v5 }
 0x193   :  { %1031 = vmatprep.subr.bf16.mxu0 %v2116_v33  ;;  %1072 = vmatprep.subr.bf16.mxu1 %v2118_v34 }
 0x248   :  { %v841_v13 = vpop.f32.mrb[20].mxu0  ;;  %v882_v6 = vpop.f32.mrb[20].mxu1 }
 0x249   :  { %v889_v8 = vadd.f32 %v841_v13, %v2267_v24  ;;  %v891_v12 = vadd.f32 %v882_v6, %v2270_v26  ;;  %v843_v23 = vpop.f32.mrb[21].mxu0  ;;  %v884_v31 = vpop.f32.mrb[21].mxu1 }
 0x24a   :  { %v890_v15 = vadd.f32 %v843_v23, %v2272_v28  ;;  %v892_v14 = vadd.f32 %v884_v31, %v2275_v29  ;;  %v845_v16 = vpop.f32.mrb[22].mxu0  ;;  %v886_v17 = vpop.f32.mrb[22].mxu1 }
 0x24b   :  { %v893_v18 = vmul.f32 0.5, %v889_v8  ;;  %v846_v19 = vpop.f32.mrb[23].mxu0  ;;  %v887_v0 = vpop.f32.mrb[23].mxu1 }
 0x24c   :  { %v897_v20 = vmul.f32 0.5, %v890_v15  ;;  %v902_v21 = vmul.f32 0.5, %v892_v14 }
 0x24d   :  { %1811 = vtanh.f32 %v893_v18  ;;  %v2659_v18 = vld [vmem:[#allocation16_spill] sm:$0xff] }
 0x24e   :  { %1813 = vtanh.f32 %v897_v20 }
 0x24f   :  { %1815 = vtanh.f32 %v891_v12 }
 0x250   :  { %1817 = vtanh.f32 %v902_v21 }
 0x257   :  { %v1812_v27 = vpop.eup %1811 }
 0x258   :  { %v1814_v24 = vpop.eup %1813  ;;  %v895_v25 = vadd.f32 1.0, %v1812_v27 }
 0x259   :  { %v899_v26 = vadd.f32 1.0, %v1814_v24  ;;  %v1816_v9 = vpop.eup %1815 }
 0x25a   :  { %v896_v7 = vmul.f32 0.5, %v895_v25  ;;  %v1818_v22 = vpop.eup %1817 }
 0x25b   :  { %v900_v28 = vmul.f32 0.5, %v899_v26  ;;  %v904_v10 = vadd.f32 1.0, %v1818_v22 }
 0x25c   :  { %v907_v11 = vmul.f32 %v1816_v9, %v896_v7 }
 0x25d   :  { %v906_v29 = vmul.f32 %v900_v28, %v2341_v53  ;;  %v905_v13 = vmul.f32 0.5, %v904_v10 }
 0x25f   :  { %v2383_v35 = vadd.f32 %v907_v11, %v906_v29 }
 0x261   :  { %1819 = vtanh.f32 %v2383_v35 }
 0x26b   :  { %v1820_v6 = vpop.eup %1819 }
 0x26c   :  { %v910_v8 = vmul.f32 %v1820_v6, %v905_v13 }
 0x26e   :  { %v918_v12 = vpack.c.bf16 %v910_v8, %v910_v8 }
 0x270   :  { %952 = vmatmul.mubr.bf16.vlgmr.msra.gmra.mrb[24].mxu0 %v918_v12  ;;  %993 = vmatmul.mubr.bf16.vlgmr.msra.gmra.mrb[24].mxu1 %v918_v12 }
 0x271   :  { %1032 = vmatpush1.bf16.msra.mxu0 %v2120_v36  ;;  %1073 = vmatpush1.bf16.msra.mxu1 %v2122_v37 }
 0x272   :  { %1033 = vmatprep.subr.bf16.mxu0 %v2126_v38  ;;  %1074 = vmatprep.subr.bf16.mxu1 %v2128_v39 }
 0x273   :  { %1063 = vmatprep.mubr.bf16.mxu0 %v2658_v30  ;;  %1104 = vmatprep.mubr.bf16.mxu1 %v2658_v30 }
 0x275   :  { %1034 = vmatpush1.bf16.msra.mxu0 %v2130_v40  ;;  %1075 = vmatpush1.bf16.msra.mxu1 %v2134_v41 }
 0x276   :  { %1035 = vmatprep.subr.bf16.mxu0 %v2138_v42  ;;  %1076 = vmatprep.subr.bf16.mxu1 %v2140_v43 }
 0x279   :  { %1036 = vmatpush1.bf16.msra.mxu0 %v2144_v45  ;;  %1077 = vmatpush1.bf16.msra.mxu1 %v2146_v46 }
 0x27a   :  { %1037 = vmatprep.subr.bf16.mxu0 %v2150_v47  ;;  %1078 = vmatprep.subr.bf16.mxu1 %v2154_v48 }
 0x27d   :  { %1038 = vmatpush1.bf16.msra.mxu0 %v2156_v49  ;;  %1079 = vmatpush1.bf16.msra.mxu1 %v2158_v50 }
 0x27e   :  { %1039 = vmatprep.subr.bf16.mxu0 %v2162_v51  ;;  %1080 = vmatprep.subr.bf16.mxu1 %v2166_v52 }
 0x281   :  { %1040 = vmatpush1.bf16.msra.mxu0 %v2172_v54  ;;  %1081 = vmatpush1.bf16.msra.mxu1 %v2174_v55 }
 0x282   :  { %1041 = vmatprep.subr.bf16.mxu0 %v2178_v56  ;;  %1082 = vmatprep.subr.bf16.mxu1 %v2180_v57 }
 0x285   :  { %1042 = vmatpush1.bf16.msra.mxu0 %v2184_v58  ;;  %1083 = vmatpush1.bf16.msra.mxu1 %v2186_v59 }
 0x286   :  { %1043 = vmatprep.subr.bf16.mxu0 %v2190_v60  ;;  %1084 = vmatprep.subr.bf16.mxu1 %v2192_v61 }
 0x289   :  { %1044 = vmatpush1.bf16.msra.mxu0 %v2198_v63  ;;  %1085 = vmatpush1.bf16.msra.mxu1 %v2200_v1 }
 0x28a   :  { %1045 = vmatprep.subr.bf16.mxu0 %v2204_v2  ;;  %1086 = vmatprep.subr.bf16.mxu1 %v2206_v3 }
 0x28d   :  { %1046 = vmatpush1.bf16.msra.mxu0 %v2210_v4  ;;  %1087 = vmatpush1.bf16.msra.mxu1 %v2212_v5 }
 0x28e   :  { %1143 = vmatprep.subr.bf16.mxu0 %v2116_v33  ;;  %1184 = vmatprep.subr.bf16.mxu1 %v2118_v34 }
 0x343   :  { %v953_v53 = vpop.f32.mrb[24].mxu0  ;;  %v994_v23 = vpop.f32.mrb[24].mxu1 }
 0x344   :  { %v1001_v31 = vadd.f32 %v953_v53, %v2277_v32  ;;  %v1003_v15 = vadd.f32 %v994_v23, %v2280_v44  ;;  %v955_v14 = vpop.f32.mrb[25].mxu0  ;;  %v996_v16 = vpop.f32.mrb[25].mxu1 }
 0x345   :  { %v1002_v17 = vadd.f32 %v955_v14, %v2282_v62  ;;  %v1004_v19 = vadd.f32 %v996_v16, %v2659_v18  ;;  %v957_v0 = vpop.f32.mrb[26].mxu0  ;;  %v998_v20 = vpop.f32.mrb[26].mxu1  ;;  %v2661_v16 = vld [vmem:[#allocation18_spill] sm:$0xff] }
 0x346   :  { %v1005_v21 = vmul.f32 0.5, %v1001_v31  ;;  %v958_v27 = vpop.f32.mrb[27].mxu0  ;;  %v999_v24 = vpop.f32.mrb[27].mxu1  ;;  %v2662_v0 = vld [vmem:[#allocation19_spill] sm:$0xff] }
 0x347   :  { %v1009_v25 = vmul.f32 0.5, %v1002_v17  ;;  %v1014_v26 = vmul.f32 0.5, %v1004_v19 }
 0x348   :  { %1821 = vtanh.f32 %v1005_v21  ;;  %v2663_v21 = vld [vmem:[#allocation20_spill] sm:$0xff] }
 0x349   :  { %1823 = vtanh.f32 %v1009_v25 }
 0x34a   :  { %1825 = vtanh.f32 %v1003_v15  ;;  %v2660_v15 = vld [vmem:[#allocation17_spill] sm:$0xff] }
 0x34b   :  { %1827 = vtanh.f32 %v1014_v26 }
 0x352   :  { %v1822_v7 = vpop.eup %1821 }
 0x353   :  { %v1824_v32 = vpop.eup %1823  ;;  %v1007_v9 = vadd.f32 1.0, %v1822_v7 }
 0x354   :  { %v1011_v44 = vadd.f32 1.0, %v1824_v32  ;;  %v1826_v11 = vpop.eup %1825 }
 0x355   :  { %v1008_v28 = vmul.f32 0.5, %v1007_v9  ;;  %v1828_v13 = vpop.eup %1827 }
 0x356   :  { %v1012_v62 = vmul.f32 0.5, %v1011_v44  ;;  %v1016_v6 = vadd.f32 1.0, %v1828_v13 }
 0x357   :  { %v1019_v29 = vmul.f32 %v1826_v11, %v1008_v28 }
 0x358   :  { %v1018_v22 = vmul.f32 %v1012_v62, %v2383_v35  ;;  %v1017_v8 = vmul.f32 0.5, %v1016_v6 }
 0x35a   :  { %v2425_v10 = vadd.f32 %v1019_v29, %v1018_v22 }
 0x35c   :  { %1829 = vtanh.f32 %v2425_v10 }
 0x366   :  { %v1830_v12 = vpop.eup %1829 }
 0x367   :  { %v1022_v53 = vmul.f32 %v1830_v12, %v1017_v8 }
 0x369   :  { %v1030_v23 = vpack.c.bf16 %v1022_v53, %v1022_v53 }
 0x36b   :  { %1064 = vmatmul.mubr.bf16.vlgmr.msra.gmra.mrb[28].mxu0 %v1030_v23  ;;  %1105 = vmatmul.mubr.bf16.vlgmr.msra.gmra.mrb[28].mxu1 %v1030_v23 }
 0x36c   :  { %1144 = vmatpush1.bf16.msra.mxu0 %v2120_v36  ;;  %1185 = vmatpush1.bf16.msra.mxu1 %v2122_v37 }
 0x36d   :  { %1145 = vmatprep.subr.bf16.mxu0 %v2126_v38  ;;  %1186 = vmatprep.subr.bf16.mxu1 %v2128_v39 }
 0x36e   :  { %1175 = vmatprep.mubr.bf16.mxu0 %v2658_v30  ;;  %1216 = vmatprep.mubr.bf16.mxu1 %v2658_v30 }
 0x370   :  { %1146 = vmatpush1.bf16.msra.mxu0 %v2130_v40  ;;  %1187 = vmatpush1.bf16.msra.mxu1 %v2134_v41 }
 0x371   :  { %1147 = vmatprep.subr.bf16.mxu0 %v2138_v42  ;;  %1188 = vmatprep.subr.bf16.mxu1 %v2140_v43 }
 0x374   :  { %1148 = vmatpush1.bf16.msra.mxu0 %v2144_v45  ;;  %1189 = vmatpush1.bf16.msra.mxu1 %v2146_v46 }
 0x375   :  { %1149 = vmatprep.subr.bf16.mxu0 %v2150_v47  ;;  %1190 = vmatprep.subr.bf16.mxu1 %v2154_v48 }
 0x378   :  { %1150 = vmatpush1.bf16.msra.mxu0 %v2156_v49  ;;  %1191 = vmatpush1.bf16.msra.mxu1 %v2158_v50 }
 0x379   :  { %1151 = vmatprep.subr.bf16.mxu0 %v2162_v51  ;;  %1192 = vmatprep.subr.bf16.mxu1 %v2166_v52 }
 0x37c   :  { %1152 = vmatpush1.bf16.msra.mxu0 %v2172_v54  ;;  %1193 = vmatpush1.bf16.msra.mxu1 %v2174_v55 }
 0x37d   :  { %1153 = vmatprep.subr.bf16.mxu0 %v2178_v56  ;;  %1194 = vmatprep.subr.bf16.mxu1 %v2180_v57 }
 0x380   :  { %1154 = vmatpush1.bf16.msra.mxu0 %v2184_v58  ;;  %1195 = vmatpush1.bf16.msra.mxu1 %v2186_v59 }
 0x381   :  { %1155 = vmatprep.subr.bf16.mxu0 %v2190_v60  ;;  %1196 = vmatprep.subr.bf16.mxu1 %v2192_v61 }
 0x384   :  { %1156 = vmatpush1.bf16.msra.mxu0 %v2198_v63  ;;  %1197 = vmatpush1.bf16.msra.mxu1 %v2200_v1 }
 0x385   :  { %1157 = vmatprep.subr.bf16.mxu0 %v2204_v2  ;;  %1198 = vmatprep.subr.bf16.mxu1 %v2206_v3 }
 0x388   :  { %1158 = vmatpush1.bf16.msra.mxu0 %v2210_v4  ;;  %1199 = vmatpush1.bf16.msra.mxu1 %v2212_v5 }
 0x389   :  { %1255 = vmatprep.subr.bf16.mxu0 %v2116_v33  ;;  %1296 = vmatprep.subr.bf16.mxu1 %v2118_v34 }
 0x43e   :  { %v1065_v35 = vpop.f32.mrb[28].mxu0  ;;  %v1106_v31 = vpop.f32.mrb[28].mxu1 }
 0x43f   :  { %v1113_v14 = vadd.f32 %v1065_v35, %v2660_v15  ;;  %v1115_v17 = vadd.f32 %v1106_v31, %v2661_v16  ;;  %v1067_v18 = vpop.f32.mrb[29].mxu0  ;;  %v1108_v19 = vpop.f32.mrb[29].mxu1 }
 0x440   :  { %v1114_v20 = vadd.f32 %v1067_v18, %v2662_v0  ;;  %v1116_v27 = vadd.f32 %v1108_v19, %v2663_v21  ;;  %v1069_v24 = vpop.f32.mrb[30].mxu0  ;;  %v1110_v25 = vpop.f32.mrb[30].mxu1 }
 0x441   :  { %v1117_v26 = vmul.f32 0.5, %v1113_v14  ;;  %v1070_v7 = vpop.f32.mrb[31].mxu0  ;;  %v1111_v32 = vpop.f32.mrb[31].mxu1 }
 0x442   :  { %v1121_v33 = vmul.f32 0.5, %v1114_v20  ;;  %v1126_v34 = vmul.f32 0.5, %v1116_v27 }
 0x443   :  { %1831 = vtanh.f32 %v1117_v26 }
 0x444   :  { %1833 = vtanh.f32 %v1121_v33 }
 0x445   :  { %1835 = vtanh.f32 %v1115_v17 }
 0x446   :  { %1837 = vtanh.f32 %v1126_v34 }
 0x44d   :  { %v1832_v9 = vpop.eup %1831 }
 0x44e   :  { %v1834_v44 = vpop.eup %1833  ;;  %v1119_v28 = vadd.f32 1.0, %v1832_v9 }
 0x44f   :  { %v1123_v11 = vadd.f32 1.0, %v1834_v44  ;;  %v1836_v29 = vpop.eup %1835 }
 0x450   :  { %v1120_v62 = vmul.f32 0.5, %v1119_v28  ;;  %v1838_v12 = vpop.eup %1837 }
 0x451   :  { %v1124_v22 = vmul.f32 0.5, %v1123_v11  ;;  %v1128_v53 = vadd.f32 1.0, %v1838_v12  ;;  %v2519_v12 = vld [vmem:[#allocation8 + $0x8] ss:$16 sps:$4 sm:$0xff]  }
 0x452   :  { %v1131_v13 = vmul.f32 %v1836_v29, %v1120_v62 }
 0x453   :  { %v1130_v6 = vmul.f32 %v1124_v22, %v2425_v10  ;;  %v1129_v23 = vmul.f32 0.5, %v1128_v53  ;;  %v2667_v10 = vld [vmem:[#allocation24_spill] sm:$0xff]  ;;  %v2525_v53 = vld [vmem:[#allocation8 + $0x2c] ss:$16 sps:$4 sm:$0xff]  }
 0x455   :  { %v2467_v8 = vadd.f32 %v1131_v13, %v1130_v6  ;;  %v2516_v6 = vld [vmem:[#allocation8] ss:$16 sps:$4 sm:$0xff]  }
 0x457   :  { %1839 = vtanh.f32 %v2467_v8 }
 0x461   :  { %v1840_v35 = vpop.eup %1839 }
 0x462   :  { %v1134_v31 = vmul.f32 %v1840_v35, %v1129_v23  ;;  %v2530_v23 = vld [vmem:[#allocation8 + $0x20] ss:$16 sps:$4 sm:$0xff]   ;;  %v2533_v35 = vld [vmem:[#allocation8 + $0x28] ss:$16 sps:$4 sm:$0xff]  }
 0x464   :  { %v1142_v15 = vpack.c.bf16 %v1134_v31, %v1134_v31  ;;  %v2536_v31 = vld [vmem:[#allocation8 + $0x44] ss:$16 sps:$4 sm:$0xff]  }
 0x466   :  { %1176 = vmatmul.mubr.bf16.vlgmr.msra.gmra.mrb[32].mxu0 %v1142_v15  ;;  %1217 = vmatmul.mubr.bf16.vlgmr.msra.gmra.mrb[32].mxu1 %v1142_v15  ;;  %v2539_v15 = vld [vmem:[#allocation8 + $0x4c] ss:$16 sps:$4 sm:$0xff]  }
 0x467   :  { %1256 = vmatpush1.bf16.msra.mxu0 %v2120_v36  ;;  %1297 = vmatpush1.bf16.msra.mxu1 %v2122_v37  ;;  %v2502_v36 = vld [vmem:[#allocation8 + $0x4] ss:$16 sps:$4 sm:$0xff]   ;;  %v2505_v37 = vld [vmem:[#allocation8 + $0xc] ss:$16 sps:$4 sm:$0xff]  }
 0x468   :  { %1257 = vmatprep.subr.bf16.mxu0 %v2126_v38  ;;  %1298 = vmatprep.subr.bf16.mxu1 %v2128_v39 }
 0x469   :  { %1287 = vmatprep.mubr.bf16.mxu0 %v2658_v30  ;;  %1328 = vmatprep.mubr.bf16.mxu1 %v2658_v30 }
 0x46b   :  { %1258 = vmatpush1.bf16.msra.mxu0 %v2130_v40  ;;  %1299 = vmatpush1.bf16.msra.mxu1 %v2134_v41  ;;  %v2664_v40 = vld [vmem:[#allocation21_spill] sm:$0xff] }
 0x46c   :  { %1259 = vmatprep.subr.bf16.mxu0 %v2138_v42  ;;  %1300 = vmatprep.subr.bf16.mxu1 %v2140_v43  ;;  %v2665_v42 = vld [vmem:[#allocation22_spill] sm:$0xff] }
 0x46f   :  { %1260 = vmatpush1.bf16.msra.mxu0 %v2144_v45  ;;  %1301 = vmatpush1.bf16.msra.mxu1 %v2146_v46 }
 0x470   :  { %1261 = vmatprep.subr.bf16.mxu0 %v2150_v47  ;;  %1302 = vmatprep.subr.bf16.mxu1 %v2154_v48  ;;  %v2666_v47 = vld [vmem:[#allocation23_spill] sm:$0xff] }
 0x473   :  { %1262 = vmatpush1.bf16.msra.mxu0 %v2156_v49  ;;  %1303 = vmatpush1.bf16.msra.mxu1 %v2158_v50 }
 0x474   :  { %1263 = vmatprep.subr.bf16.mxu0 %v2162_v51  ;;  %1304 = vmatprep.subr.bf16.mxu1 %v2166_v52 }
 0x477   :  { %1264 = vmatpush1.bf16.msra.mxu0 %v2172_v54  ;;  %1305 = vmatpush1.bf16.msra.mxu1 %v2174_v55 }
 0x478   :  { %1265 = vmatprep.subr.bf16.mxu0 %v2178_v56  ;;  %1306 = vmatprep.subr.bf16.mxu1 %v2180_v57 }
 0x47b   :  { %1266 = vmatpush1.bf16.msra.mxu0 %v2184_v58  ;;  %1307 = vmatpush1.bf16.msra.mxu1 %v2186_v59 }
 0x47c   :  { %1267 = vmatprep.subr.bf16.mxu0 %v2190_v60  ;;  %1308 = vmatprep.subr.bf16.mxu1 %v2192_v61 }
 0x47f   :  { %1268 = vmatpush1.bf16.msra.mxu0 %v2198_v63  ;;  %1309 = vmatpush1.bf16.msra.mxu1 %v2200_v1 }
 0x480   :  { %1269 = vmatprep.subr.bf16.mxu0 %v2204_v2  ;;  %1310 = vmatprep.subr.bf16.mxu1 %v2206_v3 }
 0x483   :  { %1270 = vmatpush1.bf16.msra.mxu0 %v2210_v4  ;;  %1311 = vmatpush1.bf16.msra.mxu1 %v2212_v5 }
 0x484   :  { %1367 = vmatprep.subr.bf16.mxu0 %v2502_v36  ;;  %1408 = vmatprep.subr.bf16.mxu1 %v2505_v37 }
 0x539   :  { %v1177_v38 = vpop.f32.mrb[32].mxu0  ;;  %v1218_v39 = vpop.f32.mrb[32].mxu1 }
 0x53a   :  { %v1225_v41 = vadd.f32 %v1177_v38, %v2664_v40  ;;  %v1227_v43 = vadd.f32 %v1218_v39, %v2665_v42  ;;  %v1179_v45 = vpop.f32.mrb[33].mxu0  ;;  %v1220_v46 = vpop.f32.mrb[33].mxu1  ;;  %v2542_v38 = vld [vmem:[#allocation8 + $0x40] ss:$16 sps:$4 sm:$0xff]   ;;  %v2545_v39 = vld [vmem:[#allocation8 + $0x48] ss:$16 sps:$4 sm:$0xff]  }
 0x53b   :  { %v1226_v48 = vadd.f32 %v1179_v45, %v2666_v47  ;;  %v1228_v14 = vadd.f32 %v1220_v46, %v2667_v10  ;;  %v1181_v16 = vpop.f32.mrb[34].mxu0  ;;  %v1222_v17 = vpop.f32.mrb[34].mxu1  ;;  %v2548_v40 = vld [vmem:[#allocation8 + $0x64] ss:$16 sps:$4 sm:$0xff]  }
 0x53c   :  { %v1229_v18 = vmul.f32 0.5, %v1225_v41  ;;  %v1182_v19 = vpop.f32.mrb[35].mxu0  ;;  %v1223_v0 = vpop.f32.mrb[35].mxu1  ;;  %v2551_v41 = vld [vmem:[#allocation8 + $0x6c] ss:$16 sps:$4 sm:$0xff]  }
 0x53d   :  { %v1233_v20 = vmul.f32 0.5, %v1226_v48  ;;  %v1238_v21 = vmul.f32 0.5, %v1228_v14 }
 0x53e   :  { %1841 = vtanh.f32 %v1229_v18 }
 0x53f   :  { %1843 = vtanh.f32 %v1233_v20 }
 0x540   :  { %1845 = vtanh.f32 %v1227_v43 }
 0x541   :  { %1847 = vtanh.f32 %v1238_v21 }
 0x548   :  { %v1842_v27 = vpop.eup %1841 }
 0x549   :  { %v1844_v24 = vpop.eup %1843  ;;  %v1231_v25 = vadd.f32 1.0, %v1842_v27  ;;  %v1895_v27 = vld [vmem:[#allocation8 + $0x60] ss:$16 sps:$4 sm:$0xff]  }
 0x54a   :  { %v1235_v26 = vadd.f32 1.0, %v1844_v24  ;;  %v1846_v32 = vpop.eup %1845  ;;  %v1896_v24 = vld [vmem:[#allocation8 + $0x68] ss:$16 sps:$4 sm:$0xff]  }
 0x54b   :  { %v1232_v7 = vmul.f32 0.5, %v1231_v25  ;;  %v1848_v28 = vpop.eup %1847  ;;  %v1898_v25 = vld [vmem:[#allocation8 + $0x8c] ss:$16 sps:$4 sm:$0xff]  }
 0x54c   :  { %v1236_v33 = vmul.f32 0.5, %v1235_v26  ;;  %v1240_v11 = vadd.f32 1.0, %v1848_v28  ;;  %v1899_v26 = vld [vmem:[#allocation8 + $0x80] ss:$16 sps:$4 sm:$0xff]   ;;  %v1906_v28 = vld [vmem:[#allocation8 + $0xcc] ss:$16 sps:$4 sm:$0xff]  }
 0x54d   :  { %v1243_v34 = vmul.f32 %v1846_v32, %v1232_v7  ;;  %v1900_v7 = vld [vmem:[#allocation8 + $0x88] ss:$16 sps:$4 sm:$0xff]   ;;  %v1901_v32 = vld [vmem:[#allocation8 + $0xa4] ss:$16 sps:$4 sm:$0xff]  }
 0x54e   :  { %v1242_v9 = vmul.f32 %v1236_v33, %v2467_v8  ;;  %v1241_v62 = vmul.f32 0.5, %v1240_v11  ;;  %v2522_v8 = vld [vmem:[#allocation8 + $0x24] ss:$16 sps:$4 sm:$0xff]   ;;  %v1902_v33 = vld [vmem:[#allocation8 + $0xac] ss:$16 sps:$4 sm:$0xff]  }
 0x54f   :  { %v1907_v11 = vld [vmem:[#allocation8 + $0xc0] ss:$16 sps:$4 sm:$0xff]  }
 0x550   :  { %v2513_v44 = vadd.f32 %v1243_v34, %v1242_v9  ;;  %v1903_v34 = vld [vmem:[#allocation8 + $0xa0] ss:$16 sps:$4 sm:$0xff]   ;;  %v1904_v9 = vld [vmem:[#allocation8 + $0xa8] ss:$16 sps:$4 sm:$0xff]  }
 0x552   :  { %1849 = vtanh.f32 %v2513_v44 }
 0x55c   :  { %v1850_v29 = vpop.eup %1849 }
 0x55d   :  { %v1246_v22 = vmul.f32 %v1850_v29, %v1241_v62  ;;  %v1908_v62 = vld [vmem:[#allocation8 + $0xc8] ss:$16 sps:$4 sm:$0xff]   ;;  %v1909_v29 = vld [vmem:[#allocation8 + $0xe4] ss:$16 sps:$4 sm:$0xff]  }
 0x55f   :  { %v1254_v13 = vpack.c.bf16 %v1246_v22, %v1246_v22  ;;  %v1910_v22 = vld [vmem:[#allocation8 + $0xec] ss:$16 sps:$4 sm:$0xff]  }
 0x561   :  { %1288 = vmatmul.mubr.bf16.vlgmr.msra.gmra.mrb[36].mxu0 %v1254_v13  ;;  %1329 = vmatmul.mubr.bf16.vlgmr.msra.gmra.mrb[36].mxu1 %v1254_v13  ;;  %v1911_v13 = vld [vmem:[#allocation8 + $0xe0] ss:$16 sps:$4 sm:$0xff]  }
 0x562   :  { %1368 = vmatpush1.bf16.msra.mxu0 %v2516_v6  ;;  %1409 = vmatpush1.bf16.msra.mxu1 %v2519_v12 }
 0x563   :  { %1369 = vmatprep.subr.bf16.mxu0 %v2522_v8  ;;  %1410 = vmatprep.subr.bf16.mxu1 %v2525_v53 }
 0x564   :  { %1399 = vmatprep.mubr.bf16.mxu0 %v2658_v30  ;;  %1440 = vmatprep.mubr.bf16.mxu1 %v2658_v30 }
 0x566   :  { %1370 = vmatpush1.bf16.msra.mxu0 %v2530_v23  ;;  %1411 = vmatpush1.bf16.msra.mxu1 %v2533_v35 }
 0x567   :  { %1371 = vmatprep.subr.bf16.mxu0 %v2536_v31  ;;  %1412 = vmatprep.subr.bf16.mxu1 %v2539_v15 }
 0x56a   :  { %1372 = vmatpush1.bf16.msra.mxu0 %v2542_v38  ;;  %1413 = vmatpush1.bf16.msra.mxu1 %v2545_v39 }
 0x56b   :  { %1373 = vmatprep.subr.bf16.mxu0 %v2548_v40  ;;  %1414 = vmatprep.subr.bf16.mxu1 %v2551_v41 }
 0x56e   :  { %1374 = vmatpush1.bf16.msra.mxu0 %v2156_v49  ;;  %1415 = vmatpush1.bf16.msra.mxu1 %v2158_v50 }
 0x56f   :  { %1375 = vmatprep.subr.bf16.mxu0 %v2162_v51  ;;  %1416 = vmatprep.subr.bf16.mxu1 %v2166_v52  ;;  %v2668_v51 = vld [vmem:[#allocation25_spill] sm:$0xff] }
 0x572   :  { %1376 = vmatpush1.bf16.msra.mxu0 %v2172_v54  ;;  %1417 = vmatpush1.bf16.msra.mxu1 %v2174_v55  ;;  %v2669_v54 = vld [vmem:[#allocation26_spill] sm:$0xff] }
 0x573   :  { %1377 = vmatprep.subr.bf16.mxu0 %v2178_v56  ;;  %1418 = vmatprep.subr.bf16.mxu1 %v2180_v57 }
 0x576   :  { %1378 = vmatpush1.bf16.msra.mxu0 %v2184_v58  ;;  %1419 = vmatpush1.bf16.msra.mxu1 %v2186_v59  ;;  %v2670_v58 = vld [vmem:[#allocation27_spill] sm:$0xff] }
 0x577   :  { %1379 = vmatprep.subr.bf16.mxu0 %v2190_v60  ;;  %1420 = vmatprep.subr.bf16.mxu1 %v2192_v61  ;;  %v2671_v60 = vld [vmem:[#allocation28_spill] sm:$0xff] }
 0x57a   :  { %1380 = vmatpush1.bf16.msra.mxu0 %v2198_v63  ;;  %1421 = vmatpush1.bf16.msra.mxu1 %v2200_v1 }
 0x57b   :  { %1381 = vmatprep.subr.bf16.mxu0 %v2204_v2  ;;  %1422 = vmatprep.subr.bf16.mxu1 %v2206_v3 }
 0x57e   :  { %1382 = vmatpush1.bf16.msra.mxu0 %v2210_v4  ;;  %1423 = vmatpush1.bf16.msra.mxu1 %v2212_v5 }
 0x57f   :  { %1479 = vmatprep.subr.bf16.mxu0 %v2502_v36  ;;  %1520 = vmatprep.subr.bf16.mxu1 %v2505_v37 }
 0x634   :  { %v1289_v49 = vpop.f32.mrb[36].mxu0  ;;  %v1330_v50 = vpop.f32.mrb[36].mxu1 }
 0x635   :  { %v1337_v52 = vadd.f32 %v1289_v49, %v2668_v51  ;;  %v1339_v55 = vadd.f32 %v1330_v50, %v2669_v54  ;;  %v1291_v56 = vpop.f32.mrb[37].mxu0  ;;  %v1332_v57 = vpop.f32.mrb[37].mxu1 }
 0x636   :  { %v1338_v59 = vadd.f32 %v1291_v56, %v2670_v58  ;;  %v1340_v61 = vadd.f32 %v1332_v57, %v2671_v60  ;;  %v1293_v63 = vpop.f32.mrb[38].mxu0  ;;  %v1334_v1 = vpop.f32.mrb[38].mxu1 }
 0x637   :  { %v1341_v2 = vmul.f32 0.5, %v1337_v52  ;;  %v1294_v3 = vpop.f32.mrb[39].mxu0  ;;  %v1335_v4 = vpop.f32.mrb[39].mxu1 }
 0x638   :  { %v1345_v5 = vmul.f32 0.5, %v1338_v59  ;;  %v1350_v36 = vmul.f32 0.5, %v1340_v61 }
 0x639   :  { %1851 = vtanh.f32 %v1341_v2 }
 0x63a   :  { %1853 = vtanh.f32 %v1345_v5 }
 0x63b   :  { %1855 = vtanh.f32 %v1339_v55 }
 0x63c   :  { %1857 = vtanh.f32 %v1350_v36 }
 0x643   :  { %v1852_v37 = vpop.eup %1851 }
 0x644   :  { %v1854_v42 = vpop.eup %1853  ;;  %v1343_v43 = vadd.f32 1.0, %v1852_v37 }
 0x645   :  { %v1347_v45 = vadd.f32 1.0, %v1854_v42  ;;  %v1856_v47 = vpop.eup %1855 }
 0x646   :  { %v1344_v46 = vmul.f32 0.5, %v1343_v43  ;;  %v1858_v17 = vpop.eup %1857 }
 0x647   :  { %v1348_v48 = vmul.f32 0.5, %v1347_v45  ;;  %v1352_v18 = vadd.f32 1.0, %v1858_v17  ;;  %v2677_v17 = vld [vmem:[#allocation34_spill] sm:$0xff] }
 0x648   :  { %v1355_v10 = vmul.f32 %v1856_v47, %v1344_v46 }
 0x649   :  { %v1354_v14 = vmul.f32 %v1348_v48, %v2513_v44  ;;  %v1353_v19 = vmul.f32 0.5, %v1352_v18  ;;  %v1905_v44 = vld [vmem:[#allocation8 + $0xc4] ss:$16 sps:$4 sm:$0xff]  }
 0x64b   :  { %v2579_v16 = vadd.f32 %v1355_v10, %v1354_v14  ;;  %v2676_v10 = vld [vmem:[#allocation33_spill] sm:$0xff] }
 0x64d   :  { %1859 = vtanh.f32 %v2579_v16 }
 0x657   :  { %v1860_v0 = vpop.eup %1859 }
 0x658   :  { %v1358_v20 = vmul.f32 %v1860_v0, %v1353_v19 }
 0x65a   :  { %v1366_v21 = vpack.c.bf16 %v1358_v20, %v1358_v20  ;;  %v2678_v20 = vld [vmem:[#allocation35_spill] sm:$0xff] }
 0x65c   :  { %1400 = vmatmul.mubr.bf16.vlgmr.msra.gmra.mrb[40].mxu0 %v1366_v21  ;;  %1441 = vmatmul.mubr.bf16.vlgmr.msra.gmra.mrb[40].mxu1 %v1366_v21  ;;  %v2679_v21 = vld [vmem:[#allocation36_spill] sm:$0xff] }
 0x65d   :  { %1480 = vmatpush1.bf16.msra.mxu0 %v2516_v6  ;;  %1521 = vmatpush1.bf16.msra.mxu1 %v2519_v12  ;;  %v1912_v6 = vld [vmem:[#allocation8 + $0xe8] ss:$16 sps:$4 sm:$0xff]  }
 0x65e   :  { %1481 = vmatprep.subr.bf16.mxu0 %v2522_v8  ;;  %1522 = vmatprep.subr.bf16.mxu1 %v2525_v53  ;;  %v2672_v53 = vld [vmem:[#allocation29_spill] sm:$0xff] }
 0x65f   :  { %1511 = vmatprep.mubr.bf16.mxu0 %v2658_v30  ;;  %1552 = vmatprep.mubr.bf16.mxu1 %v2658_v30  ;;  %v1897_v30 = vld [vmem:[#allocation8 + $0x84] ss:$16 sps:$4 sm:$0xff]  }
 0x661   :  { %1482 = vmatpush1.bf16.msra.mxu0 %v2530_v23  ;;  %1523 = vmatpush1.bf16.msra.mxu1 %v2533_v35  ;;  %v2673_v35 = vld [vmem:[#allocation30_spill] sm:$0xff] }
 0x662   :  { %1483 = vmatprep.subr.bf16.mxu0 %v2536_v31  ;;  %1524 = vmatprep.subr.bf16.mxu1 %v2539_v15 }
 0x665   :  { %1484 = vmatpush1.bf16.msra.mxu0 %v2542_v38  ;;  %1525 = vmatpush1.bf16.msra.mxu1 %v2545_v39  ;;  %v2674_v39 = vld [vmem:[#allocation31_spill] sm:$0xff] }
 0x666   :  { %1485 = vmatprep.subr.bf16.mxu0 %v2548_v40  ;;  %1526 = vmatprep.subr.bf16.mxu1 %v2551_v41  ;;  %v2675_v41 = vld [vmem:[#allocation32_spill] sm:$0xff] }
 0x669   :  { %1486 = vmatpush1.bf16.msra.mxu0 %v1895_v27  ;;  %1527 = vmatpush1.bf16.msra.mxu1 %v1896_v24 }
 0x66a   :  { %1487 = vmatprep.subr.bf16.mxu0 %v1897_v30  ;;  %1528 = vmatprep.subr.bf16.mxu1 %v1898_v25 }
 0x66d   :  { %1488 = vmatpush1.bf16.msra.mxu0 %v1899_v26  ;;  %1529 = vmatpush1.bf16.msra.mxu1 %v1900_v7 }
 0x66e   :  { %1489 = vmatprep.subr.bf16.mxu0 %v1901_v32  ;;  %1530 = vmatprep.subr.bf16.mxu1 %v1902_v33 }
 0x671   :  { %1490 = vmatpush1.bf16.msra.mxu0 %v1903_v34  ;;  %1531 = vmatpush1.bf16.msra.mxu1 %v1904_v9 }
 0x672   :  { %1491 = vmatprep.subr.bf16.mxu0 %v1905_v44  ;;  %1532 = vmatprep.subr.bf16.mxu1 %v1906_v28 }
 0x675   :  { %1492 = vmatpush1.bf16.msra.mxu0 %v1907_v11  ;;  %1533 = vmatpush1.bf16.msra.mxu1 %v1908_v62 }
 0x676   :  { %1493 = vmatprep.subr.bf16.mxu0 %v1909_v29  ;;  %1534 = vmatprep.subr.bf16.mxu1 %v1910_v22 }
 0x679   :  { %1494 = vmatpush1.bf16.msra.mxu0 %v1911_v13  ;;  %1535 = vmatpush1.bf16.msra.mxu1 %v1912_v6 }
 0x72f   :  { %v1401_v12 = vpop.f32.mrb[40].mxu0  ;;  %v1442_v8 = vpop.f32.mrb[40].mxu1 }
 0x730   :  { %v1449_v23 = vadd.f32 %v1401_v12, %v2672_v53  ;;  %v1451_v31 = vadd.f32 %v1442_v8, %v2673_v35  ;;  %v1403_v15 = vpop.f32.mrb[41].mxu0  ;;  %v1444_v38 = vpop.f32.mrb[41].mxu1 }
 0x731   :  { %v1450_v40 = vadd.f32 %v1403_v15, %v2674_v39  ;;  %v1452_v49 = vadd.f32 %v1444_v38, %v2675_v41  ;;  %v1405_v50 = vpop.f32.mrb[42].mxu0  ;;  %v1446_v51 = vpop.f32.mrb[42].mxu1 }
 0x732   :  { %v1453_v52 = vmul.f32 0.5, %v1449_v23  ;;  %v1406_v54 = vpop.f32.mrb[43].mxu0  ;;  %v1447_v55 = vpop.f32.mrb[43].mxu1 }
 0x733   :  { %v1457_v56 = vmul.f32 0.5, %v1450_v40  ;;  %v1462_v57 = vmul.f32 0.5, %v1452_v49 }
 0x734   :  { %1861 = vtanh.f32 %v1453_v52 }
 0x735   :  { %1863 = vtanh.f32 %v1457_v56 }
 0x736   :  { %1865 = vtanh.f32 %v1451_v31 }
 0x737   :  { %1867 = vtanh.f32 %v1462_v57 }
 0x73e   :  { %v1862_v58 = vpop.eup %1861 }
 0x73f   :  { %v1864_v59 = vpop.eup %1863  ;;  %v1455_v60 = vadd.f32 1.0, %v1862_v58 }
 0x740   :  { %v1459_v61 = vadd.f32 1.0, %v1864_v59  ;;  %v1866_v1 = vpop.eup %1865 }
 0x741   :  { %v1456_v63 = vmul.f32 0.5, %v1455_v60  ;;  %v1868_v36 = vpop.eup %1867 }
 0x742   :  { %v1460_v2 = vmul.f32 0.5, %v1459_v61  ;;  %v1464_v37 = vadd.f32 1.0, %v1868_v36 }
 0x743   :  { %v1467_v3 = vmul.f32 %v1866_v1, %v1456_v63 }
 0x744   :  { %v1466_v4 = vmul.f32 %v1460_v2, %v2579_v16  ;;  %v1465_v42 = vmul.f32 0.5, %v1464_v37 }
 0x746   :  { %v1468_v5 = vadd.f32 %v1467_v3, %v1466_v4 }
 0x748   :  { %1869 = vtanh.f32 %v1468_v5 }
 0x752   :  { %v1870_v43 = vpop.eup %1869 }
 0x753   :  { %v1470_v45 = vmul.f32 %v1870_v43, %v1465_v42 }
 0x755   :  { %v1478_v46 = vpack.c.bf16 %v1470_v45, %v1470_v45 }
 0x757   :  { %1512 = vmatmul.mubr.bf16.vlgmr.msra.gmra.mrb[44].mxu0 %v1478_v46  ;;  %1553 = vmatmul.mubr.bf16.vlgmr.msra.gmra.mrb[44].mxu1 %v1478_v46 }
 0x82a   :  { %v1513_v47 = vpop.f32.mrb[44].mxu0  ;;  %v1554_v48 = vpop.f32.mrb[44].mxu1 }
 0x82b   :  { %v1561_v14 = vadd.f32 %v1513_v47, %v2676_v10  ;;  %v1563_v18 = vadd.f32 %v1554_v48, %v2677_v17  ;;  %v1515_v19 = vpop.f32.mrb[45].mxu0  ;;  %v1556_v0 = vpop.f32.mrb[45].mxu1 }
 0x82c   :  { %v1562_v16 = vadd.f32 %v1515_v19, %v2678_v20  ;;  %v1564_v27 = vadd.f32 %v1556_v0, %v2679_v21  ;;  %v1517_v24 = vpop.f32.mrb[46].mxu0  ;;  %v1558_v30 = vpop.f32.mrb[46].mxu1 }
 0x82d   :  { %v1565_v25 = vmul.f32 0.5, %v1561_v14  ;;  %v1518_v26 = vpop.f32.mrb[47].mxu0  ;;  %v1559_v7 = vpop.f32.mrb[47].mxu1 }
 0x82e   :  { %v1569_v32 = vmul.f32 0.5, %v1562_v16  ;;  %v1574_v33 = vmul.f32 0.5, %v1564_v27 }
 0x82f   :  { %1871 = vtanh.f32 %v1565_v25 }
 0x830   :  { %1873 = vtanh.f32 %v1569_v32 }
 0x831   :  { %1875 = vtanh.f32 %v1563_v18 }
 0x832   :  { %1877 = vtanh.f32 %v1574_v33 }
 0x839   :  { %v1872_v34 = vpop.eup %1871 }
 0x83a   :  { %v1874_v9 = vpop.eup %1873  ;;  %v1567_v44 = vadd.f32 1.0, %v1872_v34 }
 0x83b   :  { %v1571_v28 = vadd.f32 1.0, %v1874_v9  ;;  %v1876_v62 = vpop.eup %1875 }
 0x83c   :  { %v1568_v11 = vmul.f32 0.5, %v1567_v44 }
 0x83d   :  { %v1572_v29 = vmul.f32 0.5, %v1571_v28 }
 0x83e   :  { %v1579_v22 = vmul.f32 %v1876_v62, %v1568_v11 }
 0x83f   :  { %v1578_v13 = vmul.f32 %v1572_v29, %v1468_v5 }
 0x841   :  { %v1580_v6 = vadd.f32 %v1579_v22, %v1578_v13 }
 0x843   :  { %1879 = vtanh.f32 %v1580_v6  ;;  %1584 = vst [vmem:[#allocation10] sm:$0xff] %v1580_v6 }
 0x844   :  { %1990 = shalt.err (!%p1987_p0)
}
 0x845   :  { %s1991_s11 = scalar_lea.hbm %s2634_s5, 128 }
 0x846   :  { %p1992_p1 = scmp.ne.s32.totalorder %s2634_s5, %s1991_s11  ;;  %p1995_p2 = scmp.lt.u32.totalorder %s1991_s11, %s2634_s5 }
 0x848   :  { %p1997_p3 = pnand %p1995_p2, %p1992_p1 }
 0x84a   :  { %2000 = shalt.err (!%p1997_p3)
}
 0x84b   :  { %1604 = dma.vmem_to_hbm [thread:$0]  %s1602_s29, 128, %s2634_s5, [#allocation11]   ;;  %v1878_v12 = vpop.eup %1877 }
 0x84c   :  { %v1576_v8 = vadd.f32 1.0, %v1878_v12  ;;  %s2041_s17 = smov [#allocation9]  }
 0x84d   :  { %s1591_s18 = sshll.u32 %s2041_s17, 4  ;;  %v1880_v23 = vpop.eup %1879  ;;  %s1592_s18 = int_to_ptr.vmem [resolvable:$true] %s1591_s18 }
 0x84e   :  { %v1577_v53 = vmul.f32 0.5, %v1576_v8  ;;  %s2001_s19 = scalar_lea.vmem %s1592_s18, 128  ;;  %p2006_p5 = scmp.lt.s32.totalorder %s1592_s18, %s1592_s18 }
 0x84f   :  { %p2002_p4 = scmp.ne.s32.totalorder %s1592_s18, %s2001_s19  ;;  %p2007_p6 = scmp.lt.s32.totalorder %s2001_s19, %s2001_s19 }
 0x850   :  { %v1582_v35 = vmul.f32 %v1880_v23, %v1577_v53 }
 0x851   :  { %p2008_p7 = por %p2007_p6, %p2006_p5 }
 0x852   :  { %1583 = vst [vmem:[#allocation9] sm:$0xff] %v1582_v35 }
 0x853   :  { %p2009_p8 = pnand %p2008_p7, %p2002_p4 }
 0x855   :  { %2012 = shalt.err (!%p2009_p8)
}
 0x856   :  { %s2013_s5 = scalar_lea.hbm %s2633_s4, 128 }
 0x857   :  { %p2014_p9 = scmp.ne.s32.totalorder %s2633_s4, %s2013_s5  ;;  %p2017_p10 = scmp.lt.u32.totalorder %s2013_s5, %s2633_s4 }
 0x859   :  { %p2019_p11 = pnand %p2017_p10, %p2014_p9 }
 0x85b   :  { %2022 = shalt.err (!%p2019_p11)
}
 0x85c   :  { %1594 = dma.vmem_to_hbm [thread:$0]  %s1592_s18, 128, %s2633_s4, [#allocation5]  }
 0x85d   :  { %2027 = dma.done.wait [#allocation5], 128  }
 0x85e   :  { %2028 = vsyncadd [#allocation5], 4294967168 }
 0x85f   :  { %2029 = dma.done.wait [#allocation11], 128  }
 0x860   :  { %2030 = vsyncadd [#allocation11], 4294967168 }
 0x861   :  { %1611 = vsyncpa [#allocation4], 1 }
 0x862   :  { %1612 = vsyncpa [#allocation7], 1 }
 0x863   :  { %1613 = vsyncpa [#allocation5], 1 }
 0x864   :  { %1614 = vsyncpa [#allocation11], 1 }

</bundles_post_ra>
